<compile_context>
chip_gen: v5e
topology: v5e:2x2
jax: 0.10.0
libtpu: 0.0.40
codegen_flags: <defaults>
</compile_context>

<pallas_src>
import functools

import numpy as np
import jax
import jax.numpy as jnp
from jax.experimental import pallas as pl
from jax.experimental.pallas import tpu as pltpu

SOBEL_X = ((1.0, 0.0, -1.0), (2.0, 0.0, -2.0), (1.0, 0.0, -1.0))
SOBEL_Y = ((1.0, 2.0, 1.0), (0.0, 0.0, 0.0), (-1.0, -2.0, -1.0))
LAPLACIAN = ((0.0, 1.0, 0.0), (1.0, -4.0, 1.0), (0.0, 1.0, 0.0))
EDGE_KERNELS = (SOBEL_X, SOBEL_Y, LAPLACIAN)


# ----------------------------------------------------------------------------- kernel
def _core_kernel(H, W, F,
                 x_ref, rhs1_ref, b1_ref, rhs2_ref, b2_ref,
                 sa_rhs_ref, sk_w_ref, sk_b_ref, edil_ref,
                 sc_ref,
                 out_ref,
                 conv_scr, sa_scr):
    WF = W * F
    BB = x_ref.shape[0]
    BH = BB * H

    x3 = x_ref[...]                                  # (BB, H, WF) f32, lane-dense
    x2 = x3.reshape(BH, WF)

    # H-padding rows of the conv scratch (W borders live in the banded RHS).
    zrow = jnp.zeros((BB, 1, WF), jnp.bfloat16)
    conv_scr[:, 0:1, :] = zrow
    conv_scr[:, H + 1:H + 2, :] = zrow

    def conv3x3(act_bf16, rhs_ref, bias_ref):
        """(BB,H,WF) bf16 activation -> (BH, n_out) f32 via one banded matmul."""
        conv_scr[:, 1:H + 1, :] = act_bf16
        lhs = jnp.concatenate(                       # 3 aligned 128-lane blocks
            [conv_scr[:, dy:dy + H, :] for dy in range(3)], axis=-1
        ).reshape(BH, 3 * WF)
        y = jnp.dot(lhs, rhs_ref[...], preferred_element_type=jnp.float32)
        return y + bias_ref[...]

    # ---- fused conv #1: recon_trunk conv1 (lanes [:WF]) and the whole edge branch
    #      collapsed to an equivalent 3x3 conv (lanes [WF:]) share one MXU matmul.
    y1 = conv3x3(x3.astype(jnp.bfloat16), rhs1_ref, b1_ref)      # (BH, 2*WF)
    c1 = y1[:, :WF]
    feas = y1[:, WF:]

    a = sc_ref[0]                                    # PReLU slope (SMEM scalar)
    c1 = jnp.maximum(c1, 0.0) + a * jnp.minimum(c1, 0.0)

    # ---- recon_trunk conv2 + residual skip
    c2 = conv3x3(c1.reshape(BB, H, WF).astype(jnp.bfloat16), rhs2_ref, b2_ref)
    out = x2 + c2                                    # (BH, WF)

    # ---- SpatialAttention -----------------------------------------------------------
    # per-pixel channel max via an in-register lane butterfly over aligned F-lane groups
    # (explicit slice+concat rolls: unambiguous semantics, stays lane-dense).
    def lane_roll(v, k):                             # out[:, i] = v[:, (i + k) % WF]
        return jnp.concatenate([v[:, k:], v[:, :k]], axis=1)

    lane = jax.lax.broadcasted_iota(jnp.int32, (BH, WF), 1)
    mx = feas
    d = F // 2
    while d >= 1:
        fwd = lane_roll(mx, d)                       # value from lane i + d
        bwd = lane_roll(mx, WF - d)                  # value from lane i - d
        partner = jnp.where((lane % (2 * d)) < d, fwd, bwd)   # lane (i XOR d)
        mx = jnp.maximum(mx, partner)
        d //= 2

    # channel mean is linear -> folded into the SA matmul weights (reads feas directly)
    zsa = jnp.zeros((BB, 3, 2 * WF), jnp.bfloat16)
    sa_scr[:, 0:3, :] = zsa
    sa_scr[:, H + 3:H + 6, :] = zsa
    sa_scr[:, 3:H + 3, 0:WF] = feas.reshape(BB, H, WF).astype(jnp.bfloat16)
    sa_scr[:, 3:H + 3, WF:2 * WF] = mx.reshape(BB, H, WF).astype(jnp.bfloat16)
    sa_lhs = jnp.concatenate(                        # 7 aligned 256-lane blocks
        [sa_scr[:, dy:dy + H, :] for dy in range(7)], axis=-1
    ).reshape(BH, 7 * 2 * WF)
    sa = jax.nn.sigmoid(jnp.dot(sa_lhs, sa_rhs_ref[...],
                                preferred_element_type=jnp.float32))     # (BH, WF)
    feas = feas * sa

    # ---- selective-kernel fusion (fc + both fcs + W-mean folded into sk_w host-side)
    U3 = (out + feas).reshape(BB, H, WF)
    Um = jnp.mean(U3, axis=1)                                            # (BB, WF)
    a01 = jnp.dot(Um.astype(jnp.bfloat16), sk_w_ref[...],
                  preferred_element_type=jnp.float32) + sk_b_ref[...]    # (BB, 2F)
    a0 = a01[:, :F]
    a1 = a01[:, F:]
    m = jnp.maximum(a0, a1)
    e0 = jnp.exp(a0 - m)
    e1 = jnp.exp(a1 - m)
    att0 = e0 / (e0 + e1)                                                # (BB, F)
    att0d = jnp.dot(att0.astype(jnp.bfloat16), edil_ref[...],
                    preferred_element_type=jnp.float32)                  # (BB, WF)
    # out*att0 + feas*att1  ==  feas + att0*(out - feas)   (att0 + att1 == 1)
    res = feas.reshape(BB, H, WF) + att0d[:, None, :] * (out - feas).reshape(BB, H, WF)
    out_ref[...] = res.astype(out_ref.dtype)


# ----------------------------------------------------------------- host-side weight prep
def _prep_weights(params, W):
    """Fold / re-layout parameters into kernel-friendly banded matrices (host side)."""
    F = int(params["rt_w1"].shape[2])
    WF = W * F
    p = {k: np.asarray(v, np.float32) for k, v in params.items()}
    edge_k = np.asarray(EDGE_KERNELS, np.float32)            # (branch, dy, dx)

    # Whole edge branch collapsed into an equivalent 3x3 conv on x + constant bias.
    w_edge = np.zeros((3, 3, F, F), np.float32)
    b_edge = p["cr_b"].reshape(F).copy()
    for i in range(3):
        A_i = (p["e_w"][i] * p["e_scale"][i][None, :]) @ p["cr_w"][i]
        w_edge += edge_k[i][:, :, None, None] * A_i[None, None]
        b_edge += (edge_k[i].sum() * p["e_b"][i] * p["e_scale"][i]
                   + p["e_bias"][i]) @ p["cr_w"][i]

    def conv_rhs(wc):          # (3,3,Fin,Fout) -> banded (3*W*Fin, W*Fout)
        fi, fo = wc.shape[2], wc.shape[3]
        rhs = np.zeros((3, W, fi, W, fo), np.float32)
        for dy in range(3):
            for wo in range(W):
                for dx in range(3):
                    wi = wo + dx - 1
                    if 0 <= wi < W:
                        rhs[dy, wi, :, wo, :] = wc[dy, dx]
        return rhs.reshape(3 * W * fi, W * fo)

    rhs1 = np.concatenate([conv_rhs(p["rt_w1"]), conv_rhs(w_edge)], axis=1)   # (3WF,2WF)
    rhs2 = conv_rhs(p["rt_w2"])                                               # (3WF, WF)
    b1row = np.concatenate([np.tile(p["rt_b1"].reshape(F), W),
                            np.tile(b_edge, W)]).reshape(1, 2 * WF)
    b2row = np.tile(p["rt_b2"].reshape(F), W).reshape(1, WF)

    # SpatialAttention 7x7 conv as one banded matmul; channel-mean folded into weights,
    # channel-max read from the dilated max half (only c==0 rows used).
    sa = np.zeros((7, 2, W, F, W, F), np.float32)
    for dy in range(7):
        for wo in range(W):
            for dx in range(7):
                wi = wo + dx - 3
                if 0 <= wi < W:
                    sa[dy, 0, wi, :, wo, :] = p["sa_w"][0, dy, dx] / F
                    sa[dy, 1, wi, 0, wo, :] = p["sa_w"][1, dy, dx]
    sa_rhs = sa.reshape(7 * 2 * WF, WF)

    # SK tail: mean-over-W, fc and both fcs folded into one matrix (no nonlinearity
    # between fc and fcs in the reference forward), plus the channel-dilation matrix.
    fcs_cat = np.concatenate([p["fcs_w"][0], p["fcs_w"][1]], axis=1)          # (D, 2F)
    pcomp = np.tile(np.eye(F, dtype=np.float32), (W, 1)) / W                  # (WF, F)
    sk_w = pcomp @ p["fc_w"] @ fcs_cat                                        # (WF, 2F)
    sk_b = (p["fc_b"].reshape(-1) @ fcs_cat
            + np.concatenate([p["fcs_b"][0], p["fcs_b"][1]])).reshape(1, 2 * F)
    edil = np.tile(np.eye(F, dtype=np.float32), (1, W))                       # (F, WF)

    bf = lambda a: jnp.asarray(a, jnp.bfloat16)
    f32 = lambda a: jnp.asarray(a, jnp.float32)
    return [bf(rhs1), f32(b1row), bf(rhs2), f32(b2row),
            bf(sa_rhs), bf(sk_w), f32(sk_b), bf(edil)]


def _grid_blocks(B):
    """Keep the grid >= 2 on chips with two TensorCores, fold the batch otherwise."""
    try:
        kind = jax.devices()[0].device_kind.lower()
    except Exception:
        kind = ""
    two_tc = any(s in kind for s in ("v4", "v5p", "v7"))
    if two_tc and B % 2 == 0:
        return 2
    return 1


# ----------------------------------------------------------------------------- wrapper
def core_module_forward(x, params):
    B, H, W, F = x.shape
    WF = W * F
    M = params["fcs_w"].shape[0]
    assert M == 2, "the forward's softmax pairing requires M == 2"
    assert WF % 128 == 0, "W*features must be a multiple of 128 for lane-dense tiles"
    assert F & (F - 1) == 0, "features must be a power of two (in-register channel max)"

    x_ld = jnp.asarray(x, jnp.float32).reshape(B, H, WF)       # lane-dense slab
    weights = _prep_weights(params, W)
    scalars = jnp.asarray(params["prelu_a"], jnp.float32).reshape(1)

    grid_b = _grid_blocks(B)
    BB = B // grid_b

    def full_spec(a):
        nd = a.ndim
        return pl.BlockSpec(a.shape, lambda b, _nd=nd: (0,) * _nd)

    grid_spec = pltpu.PrefetchScalarGridSpec(
        num_scalar_prefetch=0,
        grid=(grid_b,),
        in_specs=(
            [pl.BlockSpec((BB, H, WF), lambda b: (b, 0, 0))]
            + [full_spec(w) for w in weights]
            + [pl.BlockSpec(memory_space=pltpu.MemorySpace.SMEM)]
        ),
        out_specs=pl.BlockSpec((BB, H, WF), lambda b: (b, 0, 0)),
        scratch_shapes=[
            pltpu.VMEM((BB, H + 2, WF), jnp.bfloat16),          # H-padded conv scratch
            pltpu.VMEM((BB, H + 6, 2 * WF), jnp.bfloat16),      # H-padded SA scratch
        ],
    )
    kernel = functools.partial(_core_kernel, H, W, F)
    out = pl.pallas_call(
        kernel,
        out_shape=jax.ShapeDtypeStruct((B, H, WF), jnp.float32),
        grid_spec=grid_spec,
        compiler_params=pltpu.CompilerParams(dimension_semantics=("parallel",)),
    )(x_ld, *weights, scalars)
    return out.reshape(B, H, W, F)


# ------------------------------------------------------------------------------ params
def init_params(key, F, D, M):
    ks = jax.random.split(key, 15)
    n = lambda k, s, sc=0.1: jax.random.normal(k, s, jnp.float32) * sc
    return dict(
        rt_w1=n(ks[0], (3, 3, F, F)), rt_b1=n(ks[1], (1, F)),
        rt_w2=n(ks[2], (3, 3, F, F)), rt_b2=n(ks[3], (1, F)),
        e_w=n(ks[4], (3, F, F)), e_b=n(ks[5], (3, F)),
        e_scale=n(ks[6], (3, F)), e_bias=n(ks[7], (3, F)),
        cr_w=n(ks[8], (3, F, F)), cr_b=n(ks[9], (1, F)),
        fc_w=n(ks[10], (F, D)), fc_b=n(ks[11], (1, D)),
        fcs_w=n(ks[12], (M, D, F)), fcs_b=n(ks[13], (M, F)),
        sa_w=n(ks[14], (2, 7, 7)),
        prelu_a=jnp.array(0.25, jnp.float32),
    )


# --------------------------------------------------------------------- pure-JAX reference
def reference_forward(x, params):
    """Pure-JAX reference of the same math (for correctness check)."""
    B, H, W, F = x.shape
    hp = jax.lax.Precision.HIGHEST

    def conv3x3(inp, w, b):
        xp = jnp.pad(inp, ((0, 0), (1, 1), (1, 1), (0, 0)))
        acc = jnp.zeros((B, H, W, F), jnp.float32)
        for dy in range(3):
            for dx in range(3):
                acc = acc + jnp.einsum("bhwc,cd->bhwd",
                                       xp[:, dy:dy + H, dx:dx + W, :],
                                       w[dy, dx], precision=hp)
        return acc + b.reshape(1, 1, 1, F)

    a = params["prelu_a"]
    c1 = conv3x3(x, params["rt_w1"], params["rt_b1"])
    c1 = jnp.maximum(c1, 0.0) + a * jnp.minimum(c1, 0.0)
    out = x + conv3x3(c1, params["rt_w2"], params["rt_b2"])

    red = jnp.zeros((B, H, W, F), jnp.float32)
    for i in range(3):
        y0 = jnp.einsum("bhwc,cd->bhwd", x, params["e_w"][i], precision=hp) + params["e_b"][i]
        y0p = jnp.pad(y0 - params["e_b"][i], ((0, 0), (1, 1), (1, 1), (0, 0))) + params["e_b"][i]
        acc = jnp.zeros((B, H, W, F), jnp.float32)
        for dy in range(3):
            for dx in range(3):
                kv = EDGE_KERNELS[i][dy][dx]
                if kv != 0.0:
                    acc = acc + kv * y0p[:, dy:dy + H, dx:dx + W, :]
        fi = acc * params["e_scale"][i] + params["e_bias"][i]
        red = red + jnp.einsum("bhwc,cd->bhwd", fi, params["cr_w"][i], precision=hp)
    feas = red + params["cr_b"].reshape(1, 1, 1, F)

    avg_c = feas.mean(-1)
    max_c = feas.max(-1)
    s2p = jnp.pad(jnp.stack([avg_c, max_c], axis=-1), ((0, 0), (3, 3), (3, 3), (0, 0)))
    sa_w = params["sa_w"]
    sa = jnp.zeros((B, H, W), jnp.float32)
    for c in range(2):
        for dy in range(7):
            for dx in range(7):
                sa = sa + sa_w[c, dy, dx] * s2p[:, dy:dy + H, dx:dx + W, c]
    sa = jax.nn.sigmoid(sa)
    feas = feas * sa[..., None]

    U = out + feas
    s = U.mean(axis=(1, 2))  # (B, F)
    z = jnp.dot(s, params["fc_w"], precision=hp) + params["fc_b"]
    a0 = jnp.dot(z, params["fcs_w"][0], precision=hp) + params["fcs_b"][0]
    a1 = jnp.dot(z, params["fcs_w"][1], precision=hp) + params["fcs_b"][1]
    att = jax.nn.softmax(jnp.stack([a0, a1], axis=1), axis=1)  # (B, 2, F)
    return out * att[:, 0][:, None, None, :] + feas * att[:, 1][:, None, None, :]


if __name__ == "__main__":
    # CoreModule(features=8, M=2, G=<unused>, r=2, L=8) -> d = max(8//2, 8) = 8
    B, F, H, W = 2, 8, 16, 16
    M, r, L = 2, 2, 8
    D = max(int(F / r), L)

    key = jax.random.PRNGKey(0)
    kx, kp = jax.random.split(key)
    x = jax.random.normal(kx, (B, H, W, F), jnp.float32)
    params = init_params(kp, F, D, M)

    y = core_module_forward(x, params)
    y = jax.block_until_ready(y)

    y_ref = reference_forward(x, params)
    np.testing.assert_allclose(np.asarray(y), np.asarray(y_ref), rtol=3e-2, atol=3e-2)
    print("KERNEL_OK")
</pallas_src>

<mosaic_0001>
module attributes {stable_mosaic.version = 11 : i64} {
  func.func @_core_kernel(%arg0: i32, %arg1: memref<2x16x128xf32, #tpu.memory_space<vmem>>, %arg2: memref<384x256xbf16, #tpu.memory_space<vmem>>, %arg3: memref<1x256xf32, #tpu.memory_space<vmem>>, %arg4: memref<384x128xbf16, #tpu.memory_space<vmem>>, %arg5: memref<1x128xf32, #tpu.memory_space<vmem>>, %arg6: memref<1792x128xbf16, #tpu.memory_space<vmem>>, %arg7: memref<128x16xbf16, #tpu.memory_space<vmem>>, %arg8: memref<1x16xf32, #tpu.memory_space<vmem>>, %arg9: memref<8x128xbf16, #tpu.memory_space<vmem>>, %arg10: memref<1xf32, #tpu.memory_space<smem>>, %arg11: memref<2x16x128xf32, #tpu.memory_space<vmem>>, %arg12: memref<2x18x128xbf16, #tpu.memory_space<vmem>>, %arg13: memref<2x22x256xbf16, #tpu.memory_space<vmem>>) attributes {dimension_semantics = [#tpu.dimension_semantics<parallel>], iteration_bounds = array<i64: 1>, scalar_prefetch = 0 : i64, scratch_operands = 2 : i64, tpu.core_type = #tpu.core_type<tc>, window_params = [{transform_indices = @transform_0, window_bounds = array<i64: 2, 16, 128>}, {pipeline_mode = #tpu.pipeline_mode<synchronous>, transform_indices = @transform_1, window_bounds = array<i64: 384, 256>}, {pipeline_mode = #tpu.pipeline_mode<synchronous>, transform_indices = @transform_2, window_bounds = array<i64: 1, 256>}, {pipeline_mode = #tpu.pipeline_mode<synchronous>, transform_indices = @transform_3, window_bounds = array<i64: 384, 128>}, {pipeline_mode = #tpu.pipeline_mode<synchronous>, transform_indices = @transform_4, window_bounds = array<i64: 1, 128>}, {pipeline_mode = #tpu.pipeline_mode<synchronous>, transform_indices = @transform_5, window_bounds = array<i64: 1792, 128>}, {pipeline_mode = #tpu.pipeline_mode<synchronous>, transform_indices = @transform_6, window_bounds = array<i64: 128, 16>}, {pipeline_mode = #tpu.pipeline_mode<synchronous>, transform_indices = @transform_7, window_bounds = array<i64: 1, 16>}, {pipeline_mode = #tpu.pipeline_mode<synchronous>, transform_indices = @transform_8, window_bounds = array<i64: 8, 128>}, {transform_indices = @transform_9, window_bounds = array<i64: 1>}, {transform_indices = @transform_10, window_bounds = array<i64: 2, 16, 128>}]} {
    %c0 = arith.constant 0 : index
    %c0_0 = arith.constant 0 : index
    %c0_1 = arith.constant 0 : index
    %0 = vector.load %arg1[%c0, %c0_0, %c0_1] : memref<2x16x128xf32, #tpu.memory_space<vmem>>, vector<2x16x128xf32>
    %1 = vector.shape_cast %0 : vector<2x16x128xf32> to vector<32x128xf32>
    %cst = arith.constant 0.000000e+00 : bf16
    %2 = vector.broadcast %cst : bf16 to vector<2x1x128xbf16>
    %c0_2 = arith.constant 0 : index
    %c0_3 = arith.constant 0 : index
    %c0_4 = arith.constant 0 : index
    %3 = vector.load %arg12[%c0_2, %c0_3, %c0_4] : memref<2x18x128xbf16, #tpu.memory_space<vmem>>, vector<2x1x128xbf16>
    tpu.vector_store %arg12[%c0_2, %c0_3, %c0_4], %2 {strides = array<i32>} : memref<2x18x128xbf16, #tpu.memory_space<vmem>>, vector<2x1x128xbf16>,
    %c0_5 = arith.constant 0 : index
    %c17 = arith.constant 17 : index
    %c0_6 = arith.constant 0 : index
    %4 = vector.load %arg12[%c0_5, %c17, %c0_6] : memref<2x18x128xbf16, #tpu.memory_space<vmem>>, vector<2x1x128xbf16>
    tpu.vector_store %arg12[%c0_5, %c17, %c0_6], %2 {strides = array<i32>} : memref<2x18x128xbf16, #tpu.memory_space<vmem>>, vector<2x1x128xbf16>,
    %5 = arith.truncf %0 : vector<2x16x128xf32> to vector<2x16x128xbf16>
    %c0_7 = arith.constant 0 : index
    %c1 = arith.constant 1 : index
    %c0_8 = arith.constant 0 : index
    %6 = vector.load %arg12[%c0_7, %c1, %c0_8] : memref<2x18x128xbf16, #tpu.memory_space<vmem>>, vector<2x16x128xbf16>
    tpu.vector_store %arg12[%c0_7, %c1, %c0_8], %5 {strides = array<i32>} : memref<2x18x128xbf16, #tpu.memory_space<vmem>>, vector<2x16x128xbf16>,
    %c0_9 = arith.constant 0 : index
    %c0_10 = arith.constant 0 : index
    %c0_11 = arith.constant 0 : index
    %7 = vector.load %arg12[%c0_9, %c0_10, %c0_11] : memref<2x18x128xbf16, #tpu.memory_space<vmem>>, vector<2x16x128xbf16>
    %c0_12 = arith.constant 0 : index
    %c1_13 = arith.constant 1 : index
    %c0_14 = arith.constant 0 : index
    %8 = vector.load %arg12[%c0_12, %c1_13, %c0_14] : memref<2x18x128xbf16, #tpu.memory_space<vmem>>, vector<2x16x128xbf16>
    %c0_15 = arith.constant 0 : index
    %c2 = arith.constant 2 : index
    %c0_16 = arith.constant 0 : index
    %9 = vector.load %arg12[%c0_15, %c2, %c0_16] : memref<2x18x128xbf16, #tpu.memory_space<vmem>>, vector<2x16x128xbf16>
    %10 = tpu.concatenate %7, %8, %9 in 2 : vector<2x16x128xbf16>, vector<2x16x128xbf16>, vector<2x16x128xbf16> -> vector<2x16x384xbf16>
    %11 = vector.shape_cast %10 : vector<2x16x384xbf16> to vector<32x384xbf16>
    %c0_17 = arith.constant 0 : index
    %c0_18 = arith.constant 0 : index
    %12 = vector.load %arg2[%c0_17, %c0_18] : memref<384x256xbf16, #tpu.memory_space<vmem>>, vector<384x256xbf16>
    %cst_19 = arith.constant dense<0.000000e+00> : vector<32x256xf32>
    %13 = tpu.matmul %11, %12, %cst_19 {dimension_numbers = #tpu.dot_dimension_numbers<[1], [0], [0], [1], [0, 0, 1, 1], [], []>} : vector<32x384xbf16>, vector<384x256xbf16>, vector<32x256xf32> -> vector<32x256xf32>
    %c0_20 = arith.constant 0 : index
    %c0_21 = arith.constant 0 : index
    %14 = vector.load %arg3[%c0_20, %c0_21] : memref<1x256xf32, #tpu.memory_space<vmem>>, vector<1x256xf32>
    %15 = vector.broadcast %14 : vector<1x256xf32> to vector<32x256xf32>
    %16 = arith.addf %13, %15 : vector<32x256xf32>
    %17 = vector.extract_strided_slice %16 {offsets = [0, 0], sizes = [32, 128], strides = [1, 1]} : vector<32x256xf32> to vector<32x128xf32>
    %18 = vector.extract_strided_slice %16 {offsets = [0, 128], sizes = [32, 128], strides = [1, 1]} : vector<32x256xf32> to vector<32x128xf32>
    %c0_22 = arith.constant 0 : index
    %19 = memref.load %arg10[%c0_22] : memref<1xf32, #tpu.memory_space<smem>>
    %cst_23 = arith.constant 0.000000e+00 : f32
    %20 = vector.broadcast %cst_23 : f32 to vector<32x128xf32>
    %21 = arith.maximumf %17, %20 : vector<32x128xf32>
    %cst_24 = arith.constant 0.000000e+00 : f32
    %22 = vector.broadcast %cst_24 : f32 to vector<32x128xf32>
    %23 = arith.minimumf %17, %22 : vector<32x128xf32>
    %24 = vector.broadcast %19 : f32 to vector<32x128xf32>
    %25 = arith.mulf %24, %23 : vector<32x128xf32>
    %26 = arith.addf %21, %25 : vector<32x128xf32>
    %27 = vector.shape_cast %26 : vector<32x128xf32> to vector<2x16x128xf32>
    %28 = arith.truncf %27 : vector<2x16x128xf32> to vector<2x16x128xbf16>
    %c0_25 = arith.constant 0 : index
    %c1_26 = arith.constant 1 : index
    %c0_27 = arith.constant 0 : index
    %29 = vector.load %arg12[%c0_25, %c1_26, %c0_27] : memref<2x18x128xbf16, #tpu.memory_space<vmem>>, vector<2x16x128xbf16>
    tpu.vector_store %arg12[%c0_25, %c1_26, %c0_27], %28 {strides = array<i32>} : memref<2x18x128xbf16, #tpu.memory_space<vmem>>, vector<2x16x128xbf16>,
    %c0_28 = arith.constant 0 : index
    %c0_29 = arith.constant 0 : index
    %c0_30 = arith.constant 0 : index
    %30 = vector.load %arg12[%c0_28, %c0_29, %c0_30] : memref<2x18x128xbf16, #tpu.memory_space<vmem>>, vector<2x16x128xbf16>
    %c0_31 = arith.constant 0 : index
    %c1_32 = arith.constant 1 : index
    %c0_33 = arith.constant 0 : index
    %31 = vector.load %arg12[%c0_31, %c1_32, %c0_33] : memref<2x18x128xbf16, #tpu.memory_space<vmem>>, vector<2x16x128xbf16>
    %c0_34 = arith.constant 0 : index
    %c2_35 = arith.constant 2 : index
    %c0_36 = arith.constant 0 : index
    %32 = vector.load %arg12[%c0_34, %c2_35, %c0_36] : memref<2x18x128xbf16, #tpu.memory_space<vmem>>, vector<2x16x128xbf16>
    %33 = tpu.concatenate %30, %31, %32 in 2 : vector<2x16x128xbf16>, vector<2x16x128xbf16>, vector<2x16x128xbf16> -> vector<2x16x384xbf16>
    %34 = vector.shape_cast %33 : vector<2x16x384xbf16> to vector<32x384xbf16>
    %c0_37 = arith.constant 0 : index
    %c0_38 = arith.constant 0 : index
    %35 = vector.load %arg4[%c0_37, %c0_38] : memref<384x128xbf16, #tpu.memory_space<vmem>>, vector<384x128xbf16>
    %cst_39 = arith.constant dense<0.000000e+00> : vector<32x128xf32>
    %36 = tpu.matmul %34, %35, %cst_39 {dimension_numbers = #tpu.dot_dimension_numbers<[1], [0], [0], [1], [0, 0, 1, 1], [], []>} : vector<32x384xbf16>, vector<384x128xbf16>, vector<32x128xf32> -> vector<32x128xf32>
    %c0_40 = arith.constant 0 : index
    %c0_41 = arith.constant 0 : index
    %37 = vector.load %arg5[%c0_40, %c0_41] : memref<1x128xf32, #tpu.memory_space<vmem>>, vector<1x128xf32>
    %38 = vector.broadcast %37 : vector<1x128xf32> to vector<32x128xf32>
    %39 = arith.addf %36, %38 : vector<32x128xf32>
    %40 = arith.addf %1, %39 : vector<32x128xf32>
    %41 = tpu.iota {dimensions = array<i32: 1>} : vector<32x128xi32>
    %42 = vector.extract_strided_slice %18 {offsets = [0, 4], sizes = [32, 124], strides = [1, 1]} : vector<32x128xf32> to vector<32x124xf32>
    %43 = vector.extract_strided_slice %18 {offsets = [0, 0], sizes = [32, 4], strides = [1, 1]} : vector<32x128xf32> to vector<32x4xf32>
    %44 = tpu.concatenate %42, %43 in 1 : vector<32x124xf32>, vector<32x4xf32> -> vector<32x128xf32>
    %45 = vector.extract_strided_slice %18 {offsets = [0, 124], sizes = [32, 4], strides = [1, 1]} : vector<32x128xf32> to vector<32x4xf32>
    %46 = vector.extract_strided_slice %18 {offsets = [0, 0], sizes = [32, 124], strides = [1, 1]} : vector<32x128xf32> to vector<32x124xf32>
    %47 = tpu.concatenate %45, %46 in 1 : vector<32x4xf32>, vector<32x124xf32> -> vector<32x128xf32>
    %c8_i32 = arith.constant 8 : i32
    %c0_i32 = arith.constant 0 : i32
    %48 = arith.cmpi eq, %c8_i32, %c0_i32 : i32
    %c1_i32 = arith.constant 1 : i32
    %49 = arith.select %48, %c1_i32, %c8_i32 : i32
    %50 = vector.broadcast %49 : i32 to vector<32x128xi32>
    %51 = arith.remsi %41, %50 : vector<32x128xi32>
    %c0_i32_42 = arith.constant 0 : i32
    %52 = vector.broadcast %c0_i32_42 : i32 to vector<32x128xi32>
    %53 = arith.cmpi ne, %51, %52 : vector<32x128xi32>
    %c0_i32_43 = arith.constant 0 : i32
    %54 = vector.broadcast %c0_i32_43 : i32 to vector<32x128xi32>
    %55 = arith.cmpi slt, %51, %54 : vector<32x128xi32>
    %c0_i32_44 = arith.constant 0 : i32
    %56 = arith.cmpi slt, %49, %c0_i32_44 : i32
    %57 = vector.broadcast %56 : i1 to vector<32x128xi1>
    %58 = vector.broadcast %57 : vector<32x128xi1> to vector<32x128xi1>
    %59 = arith.xori %55, %58 : vector<32x128xi1>
    %60 = arith.andi %59, %53 : vector<32x128xi1>
    %61 = vector.broadcast %49 : i32 to vector<32x128xi32>
    %62 = arith.addi %51, %61 : vector<32x128xi32>
    %63 = arith.select %60, %62, %51 : vector<32x128xi1>, vector<32x128xi32>
    %c4_i32 = arith.constant 4 : i32
    %64 = vector.broadcast %c4_i32 : i32 to vector<32x128xi32>
    %65 = arith.cmpi slt, %63, %64 : vector<32x128xi32>
    %66 = arith.select %65, %44, %47 : vector<32x128xi1>, vector<32x128xf32>
    %67 = arith.maximumf %18, %66 : vector<32x128xf32>
    %68 = vector.extract_strided_slice %67 {offsets = [0, 2], sizes = [32, 126], strides = [1, 1]} : vector<32x128xf32> to vector<32x126xf32>
    %69 = vector.extract_strided_slice %67 {offsets = [0, 0], sizes = [32, 2], strides = [1, 1]} : vector<32x128xf32> to vector<32x2xf32>
    %70 = tpu.concatenate %68, %69 in 1 : vector<32x126xf32>, vector<32x2xf32> -> vector<32x128xf32>
    %71 = vector.extract_strided_slice %67 {offsets = [0, 126], sizes = [32, 2], strides = [1, 1]} : vector<32x128xf32> to vector<32x2xf32>
    %72 = vector.extract_strided_slice %67 {offsets = [0, 0], sizes = [32, 126], strides = [1, 1]} : vector<32x128xf32> to vector<32x126xf32>
    %73 = tpu.concatenate %71, %72 in 1 : vector<32x2xf32>, vector<32x126xf32> -> vector<32x128xf32>
    %c4_i32_45 = arith.constant 4 : i32
    %c0_i32_46 = arith.constant 0 : i32
    %74 = arith.cmpi eq, %c4_i32_45, %c0_i32_46 : i32
    %c1_i32_47 = arith.constant 1 : i32
    %75 = arith.select %74, %c1_i32_47, %c4_i32_45 : i32
    %76 = vector.broadcast %75 : i32 to vector<32x128xi32>
    %77 = arith.remsi %41, %76 : vector<32x128xi32>
    %c0_i32_48 = arith.constant 0 : i32
    %78 = vector.broadcast %c0_i32_48 : i32 to vector<32x128xi32>
    %79 = arith.cmpi ne, %77, %78 : vector<32x128xi32>
    %c0_i32_49 = arith.constant 0 : i32
    %80 = vector.broadcast %c0_i32_49 : i32 to vector<32x128xi32>
    %81 = arith.cmpi slt, %77, %80 : vector<32x128xi32>
    %c0_i32_50 = arith.constant 0 : i32
    %82 = arith.cmpi slt, %75, %c0_i32_50 : i32
    %83 = vector.broadcast %82 : i1 to vector<32x128xi1>
    %84 = vector.broadcast %83 : vector<32x128xi1> to vector<32x128xi1>
    %85 = arith.xori %81, %84 : vector<32x128xi1>
    %86 = arith.andi %85, %79 : vector<32x128xi1>
    %87 = vector.broadcast %75 : i32 to vector<32x128xi32>
    %88 = arith.addi %77, %87 : vector<32x128xi32>
    %89 = arith.select %86, %88, %77 : vector<32x128xi1>, vector<32x128xi32>
    %c2_i32 = arith.constant 2 : i32
    %90 = vector.broadcast %c2_i32 : i32 to vector<32x128xi32>
    %91 = arith.cmpi slt, %89, %90 : vector<32x128xi32>
    %92 = arith.select %91, %70, %73 : vector<32x128xi1>, vector<32x128xf32>
    %93 = arith.maximumf %67, %92 : vector<32x128xf32>
    %94 = vector.extract_strided_slice %93 {offsets = [0, 1], sizes = [32, 127], strides = [1, 1]} : vector<32x128xf32> to vector<32x127xf32>
    %95 = vector.extract_strided_slice %93 {offsets = [0, 0], sizes = [32, 1], strides = [1, 1]} : vector<32x128xf32> to vector<32x1xf32>
    %96 = tpu.concatenate %94, %95 in 1 : vector<32x127xf32>, vector<32x1xf32> -> vector<32x128xf32>
    %97 = vector.extract_strided_slice %93 {offsets = [0, 127], sizes = [32, 1], strides = [1, 1]} : vector<32x128xf32> to vector<32x1xf32>
    %98 = vector.extract_strided_slice %93 {offsets = [0, 0], sizes = [32, 127], strides = [1, 1]} : vector<32x128xf32> to vector<32x127xf32>
    %99 = tpu.concatenate %97, %98 in 1 : vector<32x1xf32>, vector<32x127xf32> -> vector<32x128xf32>
    %c2_i32_51 = arith.constant 2 : i32
    %c0_i32_52 = arith.constant 0 : i32
    %100 = arith.cmpi eq, %c2_i32_51, %c0_i32_52 : i32
    %c1_i32_53 = arith.constant 1 : i32
    %101 = arith.select %100, %c1_i32_53, %c2_i32_51 : i32
    %102 = vector.broadcast %101 : i32 to vector<32x128xi32>
    %103 = arith.remsi %41, %102 : vector<32x128xi32>
    %c0_i32_54 = arith.constant 0 : i32
    %104 = vector.broadcast %c0_i32_54 : i32 to vector<32x128xi32>
    %105 = arith.cmpi ne, %103, %104 : vector<32x128xi32>
    %c0_i32_55 = arith.constant 0 : i32
    %106 = vector.broadcast %c0_i32_55 : i32 to vector<32x128xi32>
    %107 = arith.cmpi slt, %103, %106 : vector<32x128xi32>
    %c0_i32_56 = arith.constant 0 : i32
    %108 = arith.cmpi slt, %101, %c0_i32_56 : i32
    %109 = vector.broadcast %108 : i1 to vector<32x128xi1>
    %110 = vector.broadcast %109 : vector<32x128xi1> to vector<32x128xi1>
    %111 = arith.xori %107, %110 : vector<32x128xi1>
    %112 = arith.andi %111, %105 : vector<32x128xi1>
    %113 = vector.broadcast %101 : i32 to vector<32x128xi32>
    %114 = arith.addi %103, %113 : vector<32x128xi32>
    %115 = arith.select %112, %114, %103 : vector<32x128xi1>, vector<32x128xi32>
    %c1_i32_57 = arith.constant 1 : i32
    %116 = vector.broadcast %c1_i32_57 : i32 to vector<32x128xi32>
    %117 = arith.cmpi slt, %115, %116 : vector<32x128xi32>
    %118 = arith.select %117, %96, %99 : vector<32x128xi1>, vector<32x128xf32>
    %119 = arith.maximumf %93, %118 : vector<32x128xf32>
    %cst_58 = arith.constant 0.000000e+00 : bf16
    %120 = vector.broadcast %cst_58 : bf16 to vector<2x3x256xbf16>
    %c0_59 = arith.constant 0 : index
    %c0_60 = arith.constant 0 : index
    %c0_61 = arith.constant 0 : index
    %121 = vector.load %arg13[%c0_59, %c0_60, %c0_61] : memref<2x22x256xbf16, #tpu.memory_space<vmem>>, vector<2x3x256xbf16>
    tpu.vector_store %arg13[%c0_59, %c0_60, %c0_61], %120 {strides = array<i32>} : memref<2x22x256xbf16, #tpu.memory_space<vmem>>, vector<2x3x256xbf16>,
    %c0_62 = arith.constant 0 : index
    %c19 = arith.constant 19 : index
    %c0_63 = arith.constant 0 : index
    %122 = vector.load %arg13[%c0_62, %c19, %c0_63] : memref<2x22x256xbf16, #tpu.memory_space<vmem>>, vector<2x3x256xbf16>
    tpu.vector_store %arg13[%c0_62, %c19, %c0_63], %120 {strides = array<i32>} : memref<2x22x256xbf16, #tpu.memory_space<vmem>>, vector<2x3x256xbf16>,
    %123 = vector.shape_cast %18 : vector<32x128xf32> to vector<2x16x128xf32>
    %124 = arith.truncf %123 : vector<2x16x128xf32> to vector<2x16x128xbf16>
    %c0_64 = arith.constant 0 : index
    %c3 = arith.constant 3 : index
    %c0_65 = arith.constant 0 : index
    %125 = vector.load %arg13[%c0_64, %c3, %c0_65] : memref<2x22x256xbf16, #tpu.memory_space<vmem>>, vector<2x16x128xbf16>
    tpu.vector_store %arg13[%c0_64, %c3, %c0_65], %124 {strides = array<i32>} : memref<2x22x256xbf16, #tpu.memory_space<vmem>>, vector<2x16x128xbf16>,
    %126 = vector.shape_cast %119 : vector<32x128xf32> to vector<2x16x128xf32>
    %127 = arith.truncf %126 : vector<2x16x128xf32> to vector<2x16x128xbf16>
    %c0_66 = arith.constant 0 : index
    %c3_67 = arith.constant 3 : index
    %c128 = arith.constant 128 : index
    %128 = vector.load %arg13[%c0_66, %c3_67, %c128] : memref<2x22x256xbf16, #tpu.memory_space<vmem>>, vector<2x16x128xbf16>
    tpu.vector_store %arg13[%c0_66, %c3_67, %c128], %127 {strides = array<i32>} : memref<2x22x256xbf16, #tpu.memory_space<vmem>>, vector<2x16x128xbf16>,
    %c0_68 = arith.constant 0 : index
    %c0_69 = arith.constant 0 : index
    %c0_70 = arith.constant 0 : index
    %129 = vector.load %arg13[%c0_68, %c0_69, %c0_70] : memref<2x22x256xbf16, #tpu.memory_space<vmem>>, vector<2x16x256xbf16>
    %c0_71 = arith.constant 0 : index
    %c1_72 = arith.constant 1 : index
    %c0_73 = arith.constant 0 : index
    %130 = vector.load %arg13[%c0_71, %c1_72, %c0_73] : memref<2x22x256xbf16, #tpu.memory_space<vmem>>, vector<2x16x256xbf16>
    %c0_74 = arith.constant 0 : index
    %c2_75 = arith.constant 2 : index
    %c0_76 = arith.constant 0 : index
    %131 = vector.load %arg13[%c0_74, %c2_75, %c0_76] : memref<2x22x256xbf16, #tpu.memory_space<vmem>>, vector<2x16x256xbf16>
    %c0_77 = arith.constant 0 : index
    %c3_78 = arith.constant 3 : index
    %c0_79 = arith.constant 0 : index
    %132 = vector.load %arg13[%c0_77, %c3_78, %c0_79] : memref<2x22x256xbf16, #tpu.memory_space<vmem>>, vector<2x16x256xbf16>
    %c0_80 = arith.constant 0 : index
    %c4 = arith.constant 4 : index
    %c0_81 = arith.constant 0 : index
    %133 = vector.load %arg13[%c0_80, %c4, %c0_81] : memref<2x22x256xbf16, #tpu.memory_space<vmem>>, vector<2x16x256xbf16>
    %c0_82 = arith.constant 0 : index
    %c5 = arith.constant 5 : index
    %c0_83 = arith.constant 0 : index
    %134 = vector.load %arg13[%c0_82, %c5, %c0_83] : memref<2x22x256xbf16, #tpu.memory_space<vmem>>, vector<2x16x256xbf16>
    %c0_84 = arith.constant 0 : index
    %c6 = arith.constant 6 : index
    %c0_85 = arith.constant 0 : index
    %135 = vector.load %arg13[%c0_84, %c6, %c0_85] : memref<2x22x256xbf16, #tpu.memory_space<vmem>>, vector<2x16x256xbf16>
    %136 = tpu.concatenate %129, %130, %131, %132, %133, %134, %135 in 2 : vector<2x16x256xbf16>, vector<2x16x256xbf16>, vector<2x16x256xbf16>, vector<2x16x256xbf16>, vector<2x16x256xbf16>, vector<2x16x256xbf16>, vector<2x16x256xbf16> -> vector<2x16x1792xbf16>
    %137 = vector.shape_cast %136 : vector<2x16x1792xbf16> to vector<32x1792xbf16>
    %c0_86 = arith.constant 0 : index
    %c0_87 = arith.constant 0 : index
    %138 = vector.load %arg6[%c0_86, %c0_87] : memref<1792x128xbf16, #tpu.memory_space<vmem>>, vector<1792x128xbf16>
    %cst_88 = arith.constant dense<0.000000e+00> : vector<32x128xf32>
    %139 = tpu.matmul %137, %138, %cst_88 {dimension_numbers = #tpu.dot_dimension_numbers<[1], [0], [0], [1], [0, 0, 1, 1], [], []>} : vector<32x1792xbf16>, vector<1792x128xbf16>, vector<32x128xf32> -> vector<32x128xf32>
    %140 = arith.negf %139 : vector<32x128xf32>
    %141 = math.exp %140 : vector<32x128xf32>
    %cst_89 = arith.constant 1.000000e+00 : f32
    %142 = vector.broadcast %cst_89 : f32 to vector<32x128xf32>
    %143 = arith.addf %142, %141 : vector<32x128xf32>
    %144 = arith.divf %142, %143 : vector<32x128xf32>
    %145 = arith.mulf %18, %144 : vector<32x128xf32>
    %146 = arith.addf %40, %145 : vector<32x128xf32>
    %147 = vector.shape_cast %146 : vector<32x128xf32> to vector<2x16x128xf32>
    %cst_90 = arith.constant dense<0.000000e+00> : vector<2x128xf32>
    %148 = vector.multi_reduction <add>, %147, %cst_90 [1] : vector<2x16x128xf32> to vector<2x128xf32>
    %cst_91 = arith.constant 1.600000e+01 : f32
    %149 = vector.broadcast %cst_91 : f32 to vector<2x128xf32>
    %150 = arith.divf %148, %149 : vector<2x128xf32>
    %151 = arith.truncf %150 : vector<2x128xf32> to vector<2x128xbf16>
    %c0_92 = arith.constant 0 : index
    %c0_93 = arith.constant 0 : index
    %152 = vector.load %arg7[%c0_92, %c0_93] : memref<128x16xbf16, #tpu.memory_space<vmem>>, vector<128x16xbf16>
    %cst_94 = arith.constant dense<0.000000e+00> : vector<2x16xf32>
    %153 = tpu.matmul %151, %152, %cst_94 {dimension_numbers = #tpu.dot_dimension_numbers<[1], [0], [0], [1], [0, 0, 1, 1], [], []>} : vector<2x128xbf16>, vector<128x16xbf16>, vector<2x16xf32> -> vector<2x16xf32>
    %c0_95 = arith.constant 0 : index
    %c0_96 = arith.constant 0 : index
    %154 = vector.load %arg8[%c0_95, %c0_96] : memref<1x16xf32, #tpu.memory_space<vmem>>, vector<1x16xf32>
    %155 = vector.broadcast %154 : vector<1x16xf32> to vector<2x16xf32>
    %156 = arith.addf %153, %155 : vector<2x16xf32>
    %157 = vector.extract_strided_slice %156 {offsets = [0, 0], sizes = [2, 8], strides = [1, 1]} : vector<2x16xf32> to vector<2x8xf32>
    %158 = vector.extract_strided_slice %156 {offsets = [0, 8], sizes = [2, 8], strides = [1, 1]} : vector<2x16xf32> to vector<2x8xf32>
    %159 = arith.maximumf %157, %158 : vector<2x8xf32>
    %160 = arith.subf %157, %159 : vector<2x8xf32>
    %161 = math.exp %160 : vector<2x8xf32>
    %162 = arith.subf %158, %159 : vector<2x8xf32>
    %163 = math.exp %162 : vector<2x8xf32>
    %164 = arith.addf %161, %163 : vector<2x8xf32>
    %165 = arith.divf %161, %164 : vector<2x8xf32>
    %166 = arith.truncf %165 : vector<2x8xf32> to vector<2x8xbf16>
    %c0_97 = arith.constant 0 : index
    %c0_98 = arith.constant 0 : index
    %167 = vector.load %arg9[%c0_97, %c0_98] : memref<8x128xbf16, #tpu.memory_space<vmem>>, vector<8x128xbf16>
    %cst_99 = arith.constant dense<0.000000e+00> : vector<2x128xf32>
    %168 = tpu.matmul %166, %167, %cst_99 {dimension_numbers = #tpu.dot_dimension_numbers<[1], [0], [0], [1], [0, 0, 1, 1], [], []>} : vector<2x8xbf16>, vector<8x128xbf16>, vector<2x128xf32> -> vector<2x128xf32>
    %169 = vector.shape_cast %145 : vector<32x128xf32> to vector<2x16x128xf32>
    %170 = vector.shape_cast %168 : vector<2x128xf32> to vector<2x1x128xf32>
    %171 = arith.subf %40, %145 : vector<32x128xf32>
    %172 = vector.shape_cast %171 : vector<32x128xf32> to vector<2x16x128xf32>
    %173 = vector.broadcast %170 : vector<2x1x128xf32> to vector<2x16x128xf32>
    %174 = arith.mulf %173, %172 : vector<2x16x128xf32>
    %175 = arith.addf %169, %174 : vector<2x16x128xf32>
    %c0_100 = arith.constant 0 : index
    %c0_101 = arith.constant 0 : index
    %c0_102 = arith.constant 0 : index
    %176 = vector.load %arg11[%c0_100, %c0_101, %c0_102] : memref<2x16x128xf32, #tpu.memory_space<vmem>>, vector<2x16x128xf32>
    tpu.vector_store %arg11[%c0_100, %c0_101, %c0_102], %175 {strides = array<i32>} : memref<2x16x128xf32, #tpu.memory_space<vmem>>, vector<2x16x128xf32>,
    return
  }
  func.func @transform_0(%arg0: i32) -> (i32, i32, i32) {
    %c0_i32 = arith.constant 0 : i32
    %c0_i32_0 = arith.constant 0 : i32
    %c0_i32_1 = arith.constant 0 : i32
    return %arg0, %c0_i32, %c0_i32_0 : i32, i32, i32
  }
  func.func @transform_1(%arg0: i32) -> (i32, i32) {
    %c0_i32 = arith.constant 0 : i32
    %c0_i32_0 = arith.constant 0 : i32
    %c0_i32_1 = arith.constant 0 : i32
    return %c0_i32, %c0_i32_0 : i32, i32
  }
  func.func @transform_2(%arg0: i32) -> (i32, i32) {
    %c0_i32 = arith.constant 0 : i32
    %c0_i32_0 = arith.constant 0 : i32
    %c0_i32_1 = arith.constant 0 : i32
    return %c0_i32, %c0_i32_0 : i32, i32
  }
  func.func @transform_3(%arg0: i32) -> (i32, i32) {
    %c0_i32 = arith.constant 0 : i32
    %c0_i32_0 = arith.constant 0 : i32
    %c0_i32_1 = arith.constant 0 : i32
    return %c0_i32, %c0_i32_0 : i32, i32
  }
  func.func @transform_4(%arg0: i32) -> (i32, i32) {
    %c0_i32 = arith.constant 0 : i32
    %c0_i32_0 = arith.constant 0 : i32
    %c0_i32_1 = arith.constant 0 : i32
    return %c0_i32, %c0_i32_0 : i32, i32
  }
  func.func @transform_5(%arg0: i32) -> (i32, i32) {
    %c0_i32 = arith.constant 0 : i32
    %c0_i32_0 = arith.constant 0 : i32
    %c0_i32_1 = arith.constant 0 : i32
    return %c0_i32, %c0_i32_0 : i32, i32
  }
  func.func @transform_6(%arg0: i32) -> (i32, i32) {
    %c0_i32 = arith.constant 0 : i32
    %c0_i32_0 = arith.constant 0 : i32
    %c0_i32_1 = arith.constant 0 : i32
    return %c0_i32, %c0_i32_0 : i32, i32
  }
  func.func @transform_7(%arg0: i32) -> (i32, i32) {
    %c0_i32 = arith.constant 0 : i32
    %c0_i32_0 = arith.constant 0 : i32
    %c0_i32_1 = arith.constant 0 : i32
    return %c0_i32, %c0_i32_0 : i32, i32
  }
  func.func @transform_8(%arg0: i32) -> (i32, i32) {
    %c0_i32 = arith.constant 0 : i32
    %c0_i32_0 = arith.constant 0 : i32
    %c0_i32_1 = arith.constant 0 : i32
    return %c0_i32, %c0_i32_0 : i32, i32
  }
  func.func @transform_9(%arg0: i32) -> i32 {
    %c0_i32 = arith.constant 0 : i32
    %c0_i32_0 = arith.constant 0 : i32
    return %c0_i32 : i32
  }
  func.func @transform_10(%arg0: i32) -> (i32, i32, i32) {
    %c0_i32 = arith.constant 0 : i32
    %c0_i32_0 = arith.constant 0 : i32
    %c0_i32_1 = arith.constant 0 : i32
    return %arg0, %c0_i32, %c0_i32_0 : i32, i32, i32
  }
}

</mosaic_0001>

<bundles_post_ra>
// kernel: tpu_custom_call.1
= control target key start
LH: loop header
LB: loop body
LE: loop exit
PB: predicated region body
PF: predicated region fallthrough
CT: control target
= control target key end

     0   :  { %16 = vsyncpa [#allocation6], 0  ;;  %s4918_s0 = inlined_call_operand.vmem [shape: f32[2,16,128], index: 0, kind: input, shape index: {}]   ;;  %s4919_s1 = inlined_call_operand.hbm [shape: bf16[384,256], index: 1, kind: input, shape index: {}]   ;;  %s4920_s2 = inlined_call_operand.vmem [shape: f32[1,256], index: 2, kind: input, shape index: {}]   ;;  %s4921_s3 = inlined_call_operand.hbm [shape: bf16[384,128], index: 3, kind: input, shape index: {}]   ;;  %s4922_s4 = inlined_call_operand.vmem [shape: f32[1,128], index: 4, kind: input, shape index: {}]   ;;  %s4923_s5 = inlined_call_operand.hbm [shape: bf16[1792,128], index: 5, kind: input, shape index: {}]   ;;  %s4924_s6 = inlined_call_operand.vmem [shape: bf16[128,16], index: 6, kind: input, shape index: {}]   ;;  %s4925_s7 = inlined_call_operand.vmem [shape: f32[1,16], index: 7, kind: input, shape index: {}]   ;;  %s4926_s8 = inlined_call_operand.vmem [shape: bf16[8,128], index: 8, kind: input, shape index: {}]   ;;  %s4927_s9 = inlined_call_operand.<no memory space> [shape: f32[1], index: 9, kind: input, shape index: {}]   ;;  %s4928_s10 = inlined_call_operand.hbm [shape: f32[2,16,128], index: 10, kind: output, shape index: {}]  }
   0x1   :  { %17 = vsyncpa [#allocation9], 0  ;;  %s40_s15 = sshll.u32 %s4921_s3, 4  ;;  %s41_s15 = int_to_ptr.hbm [resolvable:$true] %s40_s15 }
   0x2   :  { %18 = vsyncpa [#allocation7], 0  ;;  %s4334_s16 = smov [#allocation8]   ;;  %s25_s20 = sshll.u32 %s4919_s1, 4  ;;  %s26_s20 = int_to_ptr.hbm [resolvable:$true] %s25_s20 }
   0x3   :  { %s42_s17 = sshll.u32 %s4334_s16, 4  ;;  %s4335_s21 = smov 64   ;;  %s43_s17 = int_to_ptr.vmem [resolvable:$true] %s42_s17 }
   0x4   :  { %s4336_s22 = smov 4   ;;  %s4337_s23 = smov [#allocation5]  }
   0x5   :  { %48 = dma.hbm_to_vmem [thread:$0]  %s41_s15, 3072, %s43_s17, [#allocation9], %s4335_s21, %s4335_s21, %s4336_s22  }
   0x6   :  { %s27_s24 = sshll.u32 %s4337_s23, 4  ;;  %s4338_s25 = smov 128   ;;  %s28_s24 = int_to_ptr.vmem [resolvable:$true] %s27_s24 }
   0x7   :  { %s4339_s26 = smov 8   ;;  %s55_s28 = sshll.u32 %s4923_s5, 4  ;;  %s56_s28 = int_to_ptr.hbm [resolvable:$true] %s55_s28 }
   0x8   :  { %33 = dma.hbm_to_vmem [thread:$0]  %s26_s20, 6144, %s28_s24, [#allocation6], %s4338_s25, %s4338_s25, %s4339_s26  }
   0x9   :  { %s4340_s1 = smov [#allocation10]  }
   0xa   :  { %s57_s29 = sshll.u32 %s4340_s1, 4  ;;  %s58_s29 = int_to_ptr.vmem [resolvable:$true] %s57_s29 }
   0xb   :  { %63 = dma.hbm_to_vmem [thread:$0]  %s56_s28, 14336, %s58_s29, [#allocation9], %s4335_s21, %s4335_s21, %s4336_s22  }
   0xc   :  { %4328 = dma.done.wait [#allocation6], 6144  }
   0xd   :  { %4329 = vsyncadd [#allocation6], 4294961152 }
   0xe   :  { %4330 = dma.done.wait [#allocation9], 17408  }
   0xf   :  { %4331 = vsyncadd [#allocation9], 4294949888  ;;  %v3206_v0 = vld [vmem:[#allocation5 + $0x70] sm:$0xf]  ;;  %v3936_v1 = vld [vmem:[#allocation5 + $0x74] sm:$0xf0] }
  0x10   :  { %v3270_v2 = vld [vmem:[#allocation5 + $0xf0] sm:$0xf]  ;;  %v3207_v3 = vor.u32 %v3936_v1, %v3206_v0  ;;  %v3952_v4 = vld [vmem:[#allocation5 + $0xf4] sm:$0xf0]  ;;  %v3198_v9 = vld [vmem:[#allocation5 + $0x60] sm:$0xf] }
  0x11   :  { %v3334_v5 = vld [vmem:[#allocation5 + $0x170] sm:$0xf]  ;;  %v3968_v6 = vld [vmem:[#allocation5 + $0x174] sm:$0xf0]  ;;  %v3271_v7 = vor.u32 %v3952_v4, %v3270_v2  ;;  %v3934_v10 = vld [vmem:[#allocation5 + $0x64] sm:$0xf0] }
  0x12   :  { %v3335_v8 = vor.u32 %v3968_v6, %v3334_v5  ;;  %v3262_v11 = vld [vmem:[#allocation5 + $0xe0] sm:$0xf]  ;;  %530 = vmatpush.bf16.msra.mxu0 %v3207_v3  ;;  %v3199_v12 = vor.u32 %v3934_v10, %v3198_v9  ;;  %v3950_v13 = vld [vmem:[#allocation5 + $0xe4] sm:$0xf0]  ;;  %v3190_v18 = vld [vmem:[#allocation5 + $0x50] sm:$0xf] }
  0x13   :  { %v3326_v14 = vld [vmem:[#allocation5 + $0x160] sm:$0xf]  ;;  %v3966_v15 = vld [vmem:[#allocation5 + $0x164] sm:$0xf0]  ;;  %549 = vmatpush.bf16.msra.mxu1 %v3271_v7  ;;  %v3263_v16 = vor.u32 %v3950_v13, %v3262_v11  ;;  %v3932_v19 = vld [vmem:[#allocation5 + $0x54] sm:$0xf0] }
  0x14   :  { %568 = vmatpush.bf16.msra.mxu2 %v3335_v8  ;;  %v3327_v17 = vor.u32 %v3966_v15, %v3326_v14  ;;  %v3254_v20 = vld [vmem:[#allocation5 + $0xd0] sm:$0xf]  ;;  %v3948_v21 = vld [vmem:[#allocation5 + $0xd4] sm:$0xf0]  ;;  %v3191_v24 = vor.u32 %v3932_v19, %v3190_v18  ;;  %v3182_v27 = vld [vmem:[#allocation5 + $0x40] sm:$0xf] }
  0x15   :  { %v3318_v22 = vld [vmem:[#allocation5 + $0x150] sm:$0xf]  ;;  %v3964_v23 = vld [vmem:[#allocation5 + $0x154] sm:$0xf0]  ;;  %v3255_v25 = vor.u32 %v3948_v21, %v3254_v20  ;;  %v3930_v28 = vld [vmem:[#allocation5 + $0x44] sm:$0xf0] }
  0x16   :  { %531 = vmatpush.bf16.msra.mxu0 %v3199_v12  ;;  %v3319_v26 = vor.u32 %v3964_v23, %v3318_v22  ;;  %v3246_v29 = vld [vmem:[#allocation5 + $0xc0] sm:$0xf]  ;;  %v3946_v30 = vld [vmem:[#allocation5 + $0xc4] sm:$0xf0]  ;;  %v3935_v33 = vld [vmem:[#allocation5 + $0x74] sm:$0xf]  ;;  %v3183_v35 = vor.u32 %v3930_v28, %v3182_v27 }
  0x17   :  { %550 = vmatpush.bf16.msra.mxu1 %v3263_v16  ;;  %v3310_v31 = vld [vmem:[#allocation5 + $0x140] sm:$0xf]  ;;  %v3962_v32 = vld [vmem:[#allocation5 + $0x144] sm:$0xf0]  ;;  %v3208_v34 = vld [vmem:[#allocation5 + $0x78] sm:$0xf0]  ;;  %v3247_v39 = vor.u32 %v3946_v30, %v3246_v29 }
  0x18   :  { %569 = vmatpush.bf16.msra.mxu2 %v3327_v17  ;;  %vm89_vm0 = vcmask 1040384   ;;  %v3174_v36 = vld [vmem:[#allocation5 + $0x30] sm:$0xf]  ;;  %v3928_v37 = vld [vmem:[#allocation5 + $0x34] sm:$0xf0]  ;;  %v3211_v38 = vor.u32 %v3935_v33, %v3208_v34  ;;  %v3311_v40 = vor.u32 %v3962_v32, %v3310_v31  ;;  %v86_v6 = vld [vmem:[%s4918_s0 + $0x8] sm:$0xff] }
  0x19   :  { %vm90_vm1 = vsmask.f32 256  ;;  %v3238_v41 = vld [vmem:[#allocation5 + $0xb0] sm:$0xf]  ;;  %v3944_v42 = vld [vmem:[#allocation5 + $0xb4] sm:$0xf0]  ;;  %v3175_v49 = vor.u32 %v3928_v37, %v3174_v36  ;;  %v107_v14 = vpack.c.bf16 %v86_v6, %v86_v6 }
  0x1a   :  { %532 = vmatpush.bf16.msra.mxu0 %v3191_v24  ;;  %v3933_v43 = vld [vmem:[#allocation5 + $0x64] sm:$0xf]  ;;  %v3302_v44 = vld [vmem:[#allocation5 + $0x130] sm:$0xf]  ;;  %v3960_v45 = vld [vmem:[#allocation5 + $0x134] sm:$0xf0]  ;;  %587 = vmatpush.bf16.msra.mxu3 %v3211_v38  ;;  %v3239_v53 = vor.u32 %v3944_v42, %v3238_v41 }
  0x1b   :  { %551 = vmatpush.bf16.msra.mxu1 %v3255_v25  ;;  %v3200_v46 = vld [vmem:[#allocation5 + $0x68] sm:$0xf0]  ;;  %vm4420_vm2 = vmand %vm89_vm0, %vm90_vm1  ;;  %vm98_vm3 = vsmask.f32 7938  ;;  %v3166_v50 = vld [vmem:[#allocation5 + $0x20] sm:$0xf]  ;;  %v3303_v54 = vor.u32 %v3960_v45, %v3302_v44 }
  0x1c   :  { %570 = vmatpush.bf16.msra.mxu2 %v3319_v26  ;;  %v3203_v47 = vor.u32 %v3933_v43, %v3200_v46  ;;  %v3931_v51 = vld [vmem:[#allocation5 + $0x54] sm:$0xf]  ;;  %v3192_v52 = vld [vmem:[#allocation5 + $0x58] sm:$0xf0]  ;;  %v3926_v55 = vld [vmem:[#allocation5 + $0x24] sm:$0xf0] }
  0x1d   :  { %v3230_v56 = vld [vmem:[#allocation5 + $0xa0] sm:$0xf]  ;;  %v3942_v57 = vld [vmem:[#allocation5 + $0xa4] sm:$0xf0]  ;;  %v3195_v60 = vor.u32 %v3931_v51, %v3192_v52  ;;  %vm110_vm4 = vsmask.f32 4368  ;;  %vm4426_vm5 = vmand %vm89_vm0, %vm98_vm3  ;;  %v3167_v3 = vor.u32 %v3926_v55, %v3166_v50 }
  0x1e   :  { %533 = vmatpush.bf16.msra.mxu0 %v3183_v35  ;;  %v3294_v58 = vld [vmem:[#allocation5 + $0x120] sm:$0xf]  ;;  %v3958_v59 = vld [vmem:[#allocation5 + $0x124] sm:$0xf0]  ;;  %588 = vmatpush.bf16.msra.mxu3 %v3203_v47  ;;  %v3158_v62 = vld [vmem:[#allocation5 + $0x10] sm:$0xf]  ;;  %v3231_v4 = vor.u32 %v3942_v57, %v3230_v56 }
  0x1f   :  { %552 = vmatpush.bf16.msra.mxu1 %v3247_v39  ;;  %v3924_v63 = vld [vmem:[#allocation5 + $0x14] sm:$0xf0]  ;;  %v3929_v0 = vld [vmem:[#allocation5 + $0x44] sm:$0xf]  ;;  %v3184_v1 = vld [vmem:[#allocation5 + $0x48] sm:$0xf0]  ;;  %v3295_v10 = vor.u32 %v3958_v59, %v3294_v58 }
  0x20   :  { %571 = vmatpush.bf16.msra.mxu2 %v3311_v40  ;;  %v85_v2 = vld [vmem:[%s4918_s0] sm:$0xff]  ;;  %v3222_v5 = vld [vmem:[#allocation5 + $0x90] sm:$0xf]  ;;  %vm4929_vm6 = vcmask 1043456   ;;  %v100_v9 = vld [vmem:[#allocation2 + $0x8] sm:$0x1]  ;;  %v3187_v17 = vor.u32 %v3929_v0, %v3184_v1  ;;  %v3159_v25 = vor.u32 %v3924_v63, %v3158_v62 }
  0x21   :  { %v92_v7 = vld [vmem:[#allocation2] sm:$0x1]  ;;  %v106_v8 = vpack.c.bf16 %v85_v2, %v85_v2  ;;  %v3286_v12 = vld [vmem:[#allocation5 + $0x110] sm:$0xf]  ;;  %v101_v15 = vsel %vm4426_vm5, 0, %v100_v9  ;;  %v121_v22 = vshrl.u32 %v107_v14, 16  ;;  %vm4447_vm7 = vmor %vm90_vm1, %vm110_vm4 }
  0x22   :  { %534 = vmatpush.bf16.msra.mxu0 %v3175_v49  ;;  %v3940_v11 = vld [vmem:[#allocation5 + $0x94] sm:$0xf0]  ;;  %v93_v13 = vsel %vm4420_vm2, 0, %v92_v7  ;;  %589 = vmatpush.bf16.msra.mxu3 %v3195_v60  ;;  %v3150_v20 = vld [vmem:[#allocation5] sm:$0xf]  ;;  %v124_v23 = vshll.u32 %v107_v14, 16  ;;  %vm4453_vm8 = vmand %vm4929_vm6, %vm98_vm3 }
  0x23   :  { %553 = vmatpush.bf16.msra.mxu1 %v3239_v53  ;;  %v3956_v16 = vld [vmem:[#allocation5 + $0x114] sm:$0xf0]  ;;  %94 = vst [vmem:[#allocation2] sm:$0x1] %v93_v13  ;;  %v113_v18 = vshrl.u32 %v106_v8, 16  ;;  %v116_v19 = vshll.u32 %v106_v8, 16  ;;  %v3223_v31 = vor.u32 %v3940_v11, %v3222_v5 }
  0x24   :  { %572 = vmatpush.bf16.msra.mxu2 %v3303_v54  ;;  %v3922_v21 = vld [vmem:[#allocation5 + $0x4] sm:$0xf0]  ;;  %102 = vst [vmem:[#allocation2 + $0x8] sm:$0x1] %v101_v15  ;;  %v3927_v24 = vld [vmem:[#allocation5 + $0x34] sm:$0xf]  ;;  %v3287_v32 = vor.u32 %v3956_v16, %v3286_v12 }
  0x25   :  { %v3214_v26 = vld [vmem:[#allocation5 + $0x80] sm:$0xf]  ;;  %v3938_v27 = vld [vmem:[#allocation5 + $0x84] sm:$0xf0]  ;;  %v115_v28 = vrot.slane %v113_v18, 7  ;;  %v123_v35 = vrot.slane %v121_v22, 7  ;;  %v3151_v49 = vor.u32 %v3922_v21, %v3150_v20 }
  0x26   :  { %535 = vmatpush.bf16.msra.mxu0 %v3167_v3  ;;  %v3176_v29 = vld [vmem:[#allocation5 + $0x38] sm:$0xf0]  ;;  %v87_v30 = vld [vmem:[%s4918_s0 + $0x10] sm:$0xff]  ;;  %v3278_v33 = vld [vmem:[#allocation5 + $0x100] sm:$0xf]  ;;  %590 = vmatpush.bf16.msra.mxu3 %v3187_v17  ;;  %v3215_v53 = vor.u32 %v3938_v27, %v3214_v26  ;;  %vm227_vm9 = vcmask 1046528  }
  0x27   :  { %554 = vmatpush.bf16.msra.mxu1 %v3231_v4  ;;  %v3954_v34 = vld [vmem:[#allocation5 + $0x104] sm:$0xf0]  ;;  %v4443_v36 = vpack.c.bf16 %v87_v30, %v87_v30  ;;  %v118_v38 = vor.u32 %v116_v19, %v115_v28  ;;  %v119_v39 = vrot.slane %v115_v28, 4  ;;  %v3951_v40 = vld [vmem:[#allocation5 + $0xf4] sm:$0xf]  ;;  %v3179_v42 = vor.u32 %v3927_v24, %v3176_v29  ;;  %s4343_s23 = smov 2  }
  0x28   :  { %573 = vmatpush.bf16.msra.mxu2 %v3295_v10  ;;  %v3272_v41 = vld [vmem:[#allocation5 + $0xf8] sm:$0xf0]  ;;  %v126_v43 = vor.u32 %v124_v23, %v123_v35  ;;  %v128_v45 = vrot.slane %v123_v35, 4  ;;  %v3967_v46 = vld [vmem:[#allocation5 + $0x174] sm:$0xf]  ;;  %v3279_v54 = vor.u32 %v3954_v34, %v3278_v33  ;;  %vm1191_vm11 = vcmask 1041408  }
  0x29   :  { %v3336_v47 = vld [vmem:[#allocation5 + $0x178] sm:$0xf0]  ;;  %v3925_v50 = vld [vmem:[#allocation5 + $0x24] sm:$0xf]  ;;  %v3168_v51 = vld [vmem:[#allocation5 + $0x28] sm:$0xf0]  ;;  %v3275_v0 = vor.u32 %v3951_v40, %v3272_v41 }
  0x2a   :  { %536 = vmatpush.bf16.msra.mxu0 %v3159_v25  ;;  %v88_v52 = vld [vmem:[%s4918_s0 + $0x18] sm:$0xff]  ;;  %v127_v55 = vsel %vm4447_vm7, %v119_v39, %v126_v43  ;;  %v154_v56 = vld [vmem:[#allocation2] sm:$0xf]  ;;  %v3949_v57 = vld [vmem:[#allocation5 + $0xe4] sm:$0xf]  ;;  %v130_v60 = vshrl.u32 %v4443_v36, 16  ;;  %591 = vmatpush.bf16.msra.mxu3 %v3179_v42  ;;  %v3339_v1 = vor.u32 %v3967_v46, %v3336_v47  ;;  %v3171_v4 = vor.u32 %v3925_v50, %v3168_v51 }
  0x2b   :  { %555 = vmatpush.bf16.msra.mxu1 %v3223_v31  ;;  %v3264_v58 = vld [vmem:[#allocation5 + $0xe8] sm:$0xf0]  ;;  %v3965_v59 = vld [vmem:[#allocation5 + $0x164] sm:$0xf]  ;;  %v155_v62 = vsel %vm4453_vm8, %v118_v38, %v154_v56  ;;  %157 = vst [vmem:[#allocation2 + $0x4] sm:$0xf] %v127_v55  ;;  %v109_v7 = vpack.c.bf16 %v88_v52, %v88_v52 }
  0x2c   :  { %574 = vmatpush.bf16.msra.mxu2 %v3287_v32  ;;  %v158_v63 = vld [vmem:[#allocation2 + $0x8] sm:$0x1]  ;;  %v3328_v2 = vld [vmem:[#allocation5 + $0x168] sm:$0xf0]  ;;  %156 = vst [vmem:[#allocation2] sm:$0xf] %v155_v62  ;;  %v3267_v12 = vor.u32 %v3949_v57, %v3264_v58 }
  0x2d   :  { %v159_v3 = vsel %vm4420_vm2, %v128_v45, %v158_v63  ;;  %v3923_v5 = vld [vmem:[#allocation5 + $0x14] sm:$0xf]  ;;  %v3160_v6 = vld [vmem:[#allocation5 + $0x18] sm:$0xf0]  ;;  %v3331_v13 = vor.u32 %v3965_v59, %v3328_v2  ;;  %v95_v15 = vld [vmem:[#allocation2 + $0xc] sm:$0x1] }
  0x2e   :  { %537 = vmatpush.bf16.msra.mxu0 %v3151_v49  ;;  %160 = vst [vmem:[#allocation2 + $0x8] sm:$0x1] %v159_v3  ;;  %v3947_v8 = vld [vmem:[#allocation5 + $0xd4] sm:$0xf]  ;;  %v3256_v9 = vld [vmem:[#allocation5 + $0xd8] sm:$0xf0]  ;;  %v3163_v14 = vor.u32 %v3923_v5, %v3160_v6  ;;  %592 = vmatpush.bf16.msra.mxu3 %v3171_v4 }
  0x2f   :  { %556 = vmatpush.bf16.msra.mxu1 %v3215_v53  ;;  %v3963_v10 = vld [vmem:[#allocation5 + $0x154] sm:$0xf]  ;;  %v3320_v11 = vld [vmem:[#allocation5 + $0x158] sm:$0xf0]  ;;  %v132_v16 = vrot.slane %v130_v60, 7  ;;  %v96_v19 = vsel %vm4420_vm2, 0, %v95_v15  ;;  %v3259_v32 = vor.u32 %v3947_v8, %v3256_v9 }
  0x30   :  { %575 = vmatpush.bf16.msra.mxu2 %v3279_v54  ;;  %v103_v17 = vld [vmem:[#allocation2 + $0x14] sm:$0x1]  ;;  %v3921_v18 = vld [vmem:[#allocation5 + $0x4] sm:$0xf]  ;;  %v138_v20 = vshrl.u32 %v109_v7, 16  ;;  %v141_v21 = vshll.u32 %v109_v7, 16  ;;  %v3323_v33 = vor.u32 %v3963_v10, %v3320_v11 }
  0x31   :  { %v104_v22 = vsel %vm4426_vm5, 0, %v103_v17  ;;  %v3152_v23 = vld [vmem:[#allocation5 + $0x8] sm:$0xf0]  ;;  %97 = vst [vmem:[#allocation2 + $0xc] sm:$0x1] %v96_v19  ;;  %v133_v24 = vshll.u32 %v4443_v36, 16 }
  0x32   :  { %606 = vmatpush.bf16.msrb.mxu0 %v3275_v0  ;;  %v169_v25 = vld [vmem:[#allocation2 + $0x4] sm:$0xf]  ;;  %v3945_v26 = vld [vmem:[#allocation5 + $0xc4] sm:$0xf]  ;;  %v136_v27 = vrot.slane %v132_v16, 4  ;;  %v140_v28 = vrot.slane %v138_v20, 7  ;;  %593 = vmatpush.bf16.msra.mxu3 %v3163_v14  ;;  %v3155_v36 = vor.u32 %v3921_v18, %v3152_v23 }
  0x33   :  { %625 = vmatpush.bf16.msrb.mxu1 %v3339_v1  ;;  %105 = vst [vmem:[#allocation2 + $0x14] sm:$0x1] %v104_v22  ;;  %v4472_v29 = vld [vmem:[#allocation2] sm:$0xf]  ;;  %v181_v30 = vunpack.c.l.b16 %v169_v25  ;;  %v3248_v34 = vld [vmem:[#allocation5 + $0xc8] sm:$0xf0]  ;;  %v135_v43 = vor.u32 %v133_v24, %v132_v16 }
  0x34   :  { %v174_v31 = vld [vmem:[#allocation2] sm:$0xe]  ;;  %v180_v61 = vunpack.c.l.b16 %v4472_v29  ;;  %v3961_v39 = vld [vmem:[#allocation5 + $0x144] sm:$0xf]  ;;  %v3312_v40 = vld [vmem:[#allocation5 + $0x148] sm:$0xf0]  ;;  %v143_v41 = vor.u32 %v141_v21, %v140_v28  ;;  %v3251_v52 = vor.u32 %v3945_v26, %v3248_v34 }
  0x35   :  { %v172_v35 = vld [vmem:[#allocation2 + $0x8] sm:$0x1]  ;;  %v223_v38 = vunpack.c.l.b16 %v174_v31  ;;  %v145_v49 = vrot.slane %v140_v28, 4  ;;  %v3943_v50 = vld [vmem:[#allocation5 + $0xb4] sm:$0xf]  ;;  %v3315_v53 = vor.u32 %v3961_v39, %v3312_v40  ;;  %vm1194_vm13 = vcmask 1045508  }
  0x36   :  { %607 = vmatpush.bf16.msrb.mxu0 %v3267_v12  ;;  %v190_v42 = vunpack.c.l.b16 %v172_v35  ;;  %v184_v45 = vpack.c.b16 %v181_v30, %v180_v61  ;;  %v144_v47 = vsel %vm4447_vm7, %v136_v27, %v143_v41  ;;  %v3240_v54 = vld [vmem:[#allocation5 + $0xb8] sm:$0xf0]  ;;  %v3959_v55 = vld [vmem:[#allocation5 + $0x134] sm:$0xf]  ;;  %594 = vmatpush.bf16.msra.mxu3 %v3155_v36  ;;  %vm194_vm10 = vsmask.f32 7424 }
  0x37   :  { %626 = vmatpush.bf16.msrb.mxu1 %v3331_v13  ;;  %v225_v46 = vpack.c.b16 %v181_v30, %v223_v38  ;;  %164 = vst [vmem:[#allocation2 + $0x10] sm:$0xf] %v144_v47  ;;  %v3304_v1 = vld [vmem:[#allocation5 + $0x138] sm:$0xf0]  ;;  %v3243_v6 = vor.u32 %v3943_v50, %v3240_v54  ;;  %v3941_v7 = vld [vmem:[#allocation5 + $0xa4] sm:$0xf] }
  0x38   :  { %v192_v51 = vpack.c.b16 %v190_v42, %v190_v42  ;;  %538 = vmatmul.bf16.vlgmr.msra.gmra.mxu0 %v184_v45  ;;  %v196_v56 = vshrl.u32 %v184_v45, 16  ;;  %v198_v57 = vshll.u32 %v184_v45, 16  ;;  %v161_v59 = vld [vmem:[#allocation2 + $0xc] sm:$0xf]  ;;  %v3307_v9 = vor.u32 %v3959_v55, %v3304_v1  ;;  %v3232_v10 = vld [vmem:[#allocation5 + $0xa8] sm:$0xf0] }
  0x39   :  { %v228_v58 = vrot.slane %v225_v46, 1  ;;  %v162_v63 = vsel %vm4453_vm8, %v135_v43, %v161_v59  ;;  %595 = vmatmul.bf16.vlgmr.msra.gmra.mxu3 %v184_v45  ;;  %v3957_v11 = vld [vmem:[#allocation5 + $0x124] sm:$0xf]  ;;  %v3296_v12 = vld [vmem:[#allocation5 + $0x128] sm:$0xf0]  ;;  %v3235_v14 = vor.u32 %v3941_v7, %v3232_v10  ;;  %v3976_v47 = vld [vmem:[#allocation8 + $0x38] sm:$0xff] }
  0x3a   :  { %608 = vmatpush.bf16.msrb.mxu0 %v3259_v32  ;;  %v203_v60 = vshll.u32 %v192_v51, 16  ;;  %v229_v62 = vrot.slane %v192_v51, 1  ;;  %v165_v0 = vld [vmem:[#allocation2 + $0x14] sm:$0x1]  ;;  %v200_v2 = vrot.slane %v198_v57, 1  ;;  %v3299_v15 = vor.u32 %v3957_v11, %v3296_v12  ;;  %981 = vmatpush.bf16.msrb.mxu2 %v3976_v47  ;;  %v3992_v50 = vld [vmem:[#allocation8 + $0xb8] sm:$0xff] }
  0x3b   :  { %627 = vmatpush.bf16.msrb.mxu1 %v3323_v33  ;;  %163 = vst [vmem:[#allocation2 + $0xc] sm:$0xf] %v162_v63  ;;  %v166_v3 = vsel %vm4420_vm2, %v145_v49, %v165_v0  ;;  %v3939_v16 = vld [vmem:[#allocation5 + $0x94] sm:$0xf]  ;;  %v3224_v17 = vld [vmem:[#allocation5 + $0x98] sm:$0xf0] }
  0x3c   :  { %v205_v4 = vrot.slane %v203_v60, 1  ;;  %v230_v5 = vsel %vm227_vm9, %v228_v58, %v229_v62  ;;  %167 = vst [vmem:[#allocation2 + $0x14] sm:$0x1] %v166_v3  ;;  %v201_v8 = vor.u32 %v200_v2, %v196_v56  ;;  %v3955_v18 = vld [vmem:[#allocation5 + $0x114] sm:$0xf]  ;;  %v3227_v25 = vor.u32 %v3939_v16, %v3224_v17  ;;  %v3974_v51 = vld [vmem:[#allocation8 + $0x28] sm:$0xff] }
  0x3d   :  { %576 = vmatmul.bf16.vlgmr.msra.gmra.mxu2 %v230_v5  ;;  %v3288_v22 = vld [vmem:[#allocation5 + $0x118] sm:$0xf0]  ;;  %v3937_v28 = vld [vmem:[#allocation5 + $0x84] sm:$0xf]  ;;  %v3216_v30 = vld [vmem:[#allocation5 + $0x88] sm:$0xf0]  ;;  %v4511_v17 = vstv %s4927_s9 }
  0x3e   :  { %609 = vmatpush.bf16.msrb.mxu0 %v3251_v52  ;;  %v206_v13 = vsel %vm194_vm10, %v201_v8, %v205_v4  ;;  %v4226_v20 = vld [vmem:[#allocation2 + $0xc] sm:$0xf0]  ;;  %v3291_v27 = vor.u32 %v3955_v18, %v3288_v22  ;;  %v3953_v32 = vld [vmem:[#allocation5 + $0x104] sm:$0xf]  ;;  %v3280_v33 = vld [vmem:[#allocation5 + $0x108] sm:$0xf0]  ;;  %v3219_v39 = vor.u32 %v3937_v28, %v3216_v30 }
  0x3f   :  { %628 = vmatpush.bf16.msrb.mxu1 %v3315_v53  ;;  %v3283_v41 = vor.u32 %v3953_v32, %v3280_v33  ;;  %v3975_v49 = vld [vmem:[#allocation8 + $0x30] sm:$0xff]  ;;  %v3984_v52 = vld [vmem:[#allocation8 + $0x78] sm:$0xff]  ;;  %v3973_v54 = vld [vmem:[#allocation8 + $0x20] sm:$0xff]  ;;  %vm1192_vm12 = vsmask.f32 1280  ;;  %vm1204_vm3 = vcmask 1042433  }
  0x40   :  { %557 = vmatmul.bf16.vlgmr.msra.gmra.mxu1 %v206_v13  ;;  %982 = vmatpush.bf16.msrb.mxu2 %v3975_v49  ;;  %v3991_v53 = vld [vmem:[#allocation8 + $0xb0] sm:$0xff]  ;;  %v3990_v56 = vld [vmem:[#allocation8 + $0xa8] sm:$0xff]  ;;  %v4488_v57 = vld [vmem:[%s4920_s2] sm:$0x3]  ;;  %vm4930_vm15 = vsmask.f32 5376 }
  0x41   :  { %1000 = vmatpush.bf16.msrb.mxu3 %v3984_v52  ;;  %v3983_v55 = vld [vmem:[#allocation8 + $0x70] sm:$0xff]  ;;  %v3972_v58 = vld [vmem:[#allocation8 + $0x18] sm:$0xff]  ;;  %v3982_v59 = vld [vmem:[#allocation8 + $0x68] sm:$0xff]  ;;  %v4491_v62 = vperm.slane %v4488_v57, 0  ;;  %vm1205_vm4 = vsmask.f32 7942 }
  0x42   :  { %610 = vmatpush.bf16.msrb.mxu0 %v3243_v6  ;;  %v170_v19 = vld [vmem:[#allocation2 + $0xc] sm:$0xff]   ;;  %v3971_v0 = vld [vmem:[#allocation8 + $0x10] sm:$0xff]  ;;  %v3988_v3 = vld [vmem:[#allocation8 + $0x98] sm:$0xff]  ;;  %vm1207_vm5 = vcmask 1046533   ;;  %s4341_s9 = smov 124   ;;  %s4344_s24 = smov 1  }
  0x43   :  { %629 = vmatpush.bf16.msrb.mxu1 %v3307_v9  ;;  %v4227_v21 = vld [vmem:[#allocation2 + $0xc] sm:$0xe]  ;;  %v173_v23 = vld [vmem:[#allocation2 + $0x14] sm:$0x1]  ;;  %v208_v34 = vshrl.u32 %v170_v19, 16  ;;  %v210_v61 = vshll.u32 %v170_v19, 16  ;;  %vm4495_vm14 = vmand %vm1191_vm11, %vm1192_vm12 }
  0x44   :  { %v191_v24 = vunpack.c.l.b16 %v173_v23  ;;  %v4228_v26 = vor.u32 %v4227_v21, %v4226_v20  ;;  %983 = vmatpush.bf16.msrb.mxu2 %v3974_v51  ;;  %v3989_v63 = vld [vmem:[#allocation8 + $0xa0] sm:$0xff]  ;;  %v3970_v4 = vld [vmem:[#allocation8 + $0x8] sm:$0xff]  ;;  %v3980_v6 = vld [vmem:[#allocation8 + $0x58] sm:$0xff]  ;;  %vm1208_vm11 = vsmask.f32 7958  ;;  %s4345_s3 = smov 127  }
  0x45   :  { %v212_v40 = vrot.slane %v210_v61, 1  ;;  %1001 = vmatpush.bf16.msrb.mxu3 %v3983_v55  ;;  %v3981_v1 = vld [vmem:[#allocation8 + $0x60] sm:$0xff]  ;;  %v3987_v9 = vld [vmem:[#allocation8 + $0x90] sm:$0xff]  ;;  %vm4500_vm0 = vmand %vm1194_vm13, %vm4930_vm15  ;;  %s4347_s1 = smov 120   ;;  %s3134_s12 = sshll.u32 %s4928_s10, 4  ;;  %s3135_s12 = int_to_ptr.hbm [resolvable:$true] %s3134_s12 }
  0x46   :  { %611 = vmatpush.bf16.msrb.mxu0 %v3235_v14  ;;  %v193_v31 = vpack.c.b16 %v191_v24, %v191_v24  ;;  %v231_v35 = vrot.slane %v4228_v26, 1  ;;  %v3969_v12 = vld [vmem:[#allocation8] sm:$0xff]  ;;  %v1198_v14 = vld [vmem:[#allocation3] sm:$0x33]  ;;  %vm1197_vm1 = vmor %vm4500_vm0, %vm4495_vm14 }
  0x47   :  { %630 = vmatpush.bf16.msrb.mxu1 %v3299_v15  ;;  %v213_v45 = vor.u32 %v212_v40, %v208_v34  ;;  %v3979_v16 = vld [vmem:[#allocation8 + $0x50] sm:$0xff]  ;;  %v1199_v18 = vsel %vm1197_vm1, 0, %v1198_v14  ;;  %v3986_v21 = vld [vmem:[#allocation8 + $0x88] sm:$0xff]  ;;  %v3985_v30 = vld [vmem:[#allocation8 + $0x80] sm:$0xff] }
  0x48   :  { %v215_v38 = vshll.u32 %v193_v31, 16  ;;  %v232_v36 = vrot.slane %v193_v31, 1  ;;  %543 = vmatmul.bf16.gmra.mxu0 %v170_v19  ;;  %984 = vmatpush.bf16.msrb.mxu2 %v3973_v54  ;;  %1200 = vst [vmem:[#allocation3] sm:$0x33] %v1199_v18  ;;  %v3977_v34 = vld [vmem:[#allocation8 + $0x40] sm:$0xff]  ;;  %vm4521_vm13 = vmand %vm1204_vm3, %vm1205_vm4  ;;  %v4087_v10 = vld [vmem:[#allocation10 + $0x2f0] sm:$0xff] }
  0x49   :  { %600 = vmatmul.bf16.gmra.mxu3 %v170_v19  ;;  %vm4525_vm6 = vmand %vm1207_vm5, %vm1208_vm11  ;;  %v1201_v55 = vld [vmem:[#allocation3 + $0x18] sm:$0x33]  ;;  %vm1671_vm5 = vcmask 1044480  }
  0x4a   :  { %612 = vmatpush.bf16.msrb.mxu0 %v3227_v25  ;;  %v217_v42 = vrot.slane %v215_v38, 1  ;;  %v233_v43 = vsel %vm227_vm9, %v231_v35, %v232_v36  ;;  %1002 = vmatpush.bf16.msrb.mxu3 %v3982_v59  ;;  %v3978_v25 = vld [vmem:[#allocation8 + $0x48] sm:$0xff]  ;;  %v1211_v38 = vld [vmem:[#allocation3 + $0x10] sm:$0x66]  ;;  %vm1210_vm15 = vmor %vm4525_vm6, %vm4521_vm13  ;;  %vm1221_vm6 = vsmask.f32 5392 }
  0x4b   :  { %631 = vmatpush.bf16.msrb.mxu1 %v3291_v27 }
  0x4c   :  { %v218_v46 = vsel %vm194_vm10, %v213_v45, %v217_v42  ;;  %985 = vmatpush.bf16.msrb.mxu2 %v3972_v58 }
  0x4d   :  { %581 = vmatmul.bf16.gmra.mxu2 %v233_v43 }
  0x4e   :  { %613 = vmatpush.bf16.msrb.mxu0 %v3219_v39  ;;  %1003 = vmatpush.bf16.msrb.mxu3 %v3981_v1 }
  0x4f   :  { %632 = vmatpush.bf16.msrb.mxu1 %v3283_v41  ;;  %v1212_v41 = vsel %vm1210_vm15, 0, %v1211_v38 }
  0x50   :  { %562 = vmatmul.bf16.gmra.mxu1 %v218_v46  ;;  %986 = vmatpush.bf16.msrb.mxu2 %v3971_v0  ;;  %1213 = vst [vmem:[#allocation3 + $0x10] sm:$0x66] %v1212_v41 }
  0x52   :  { %1019 = vmatpush.bf16.msra.mxu0 %v3992_v50  ;;  %1004 = vmatpush.bf16.msrb.mxu3 %v3980_v6 }
  0x54   :  { %987 = vmatpush.bf16.msrb.mxu2 %v3970_v4 }
  0x56   :  { %1020 = vmatpush.bf16.msra.mxu0 %v3991_v53  ;;  %1005 = vmatpush.bf16.msrb.mxu3 %v3979_v16 }
  0x58   :  { %614 = vmatmul.bf16.vlgmr.msrb.gmra.mxu0 %v206_v13  ;;  %988 = vmatpush.bf16.msrb.mxu2 %v3969_v12 }
  0x5a   :  { %1021 = vmatpush.bf16.msra.mxu0 %v3990_v56  ;;  %1006 = vmatpush.bf16.msrb.mxu3 %v3978_v25 }
  0x5e   :  { %1022 = vmatpush.bf16.msra.mxu0 %v3989_v63  ;;  %1007 = vmatpush.bf16.msrb.mxu3 %v3977_v34  ;;  %v4549_v63 = vperm.slane %v4488_v57, 1 }
  0x60   :  { %633 = vmatmul.bf16.vlgmr.msrb.gmra.mxu1 %v230_v5 }
  0x62   :  { %1023 = vmatpush.bf16.msra.mxu0 %v3988_v3 }
  0x66   :  { %1024 = vmatpush.bf16.msra.mxu0 %v3987_v9 }
  0x68   :  { %619 = vmatmul.bf16.gmra.mxu0 %v218_v46 }
  0x6a   :  { %1025 = vmatpush.bf16.msra.mxu0 %v3986_v21 }
  0x6e   :  { %1026 = vmatpush.bf16.msra.mxu0 %v3985_v30 }
  0x70   :  { %638 = vmatmul.bf16.gmra.mxu1 %v233_v43 }
  0xb5   :  { %v539_v60 = vpop.f32.mrf.mxu0 }
  0xb6   :  { %v540_v2 = vadd.f32 %v539_v60, %v4491_v62  ;;  %v1202_v60 = vsel %vm1197_vm1, 0, %v1201_v55 }
  0xb7   :  { %1203 = vst [vmem:[#allocation3 + $0x18] sm:$0x33] %v1202_v60  ;;  %v716_v60 = vld [vmem:[#allocation2 + $0x14] sm:$0x1] }
  0xbc   :  { %v596_v49 = vpop.f32.mrf.mxu3 }
  0xbd   :  { %v558_v5 = vpop.f32.mrf.mxu1  ;;  %v541_v7 = vpop.f32.mrf.mxu0  ;;  %v597_v9 = vadd.f32 %v596_v49, %v4549_v63 }
  0xbe   :  { %v559_v8 = vadd.f32 %v558_v5, %v540_v2  ;;  %v542_v20 = vadd.f32 %v541_v7, %v4491_v62 }
  0xc0   :  { %v577_v11 = vpop.f32.mrf.mxu2 }
  0xc1   :  { %v578_v15 = vadd.f32 %v577_v11, %v559_v8  ;;  %v709_v8 = vld [vmem:[#allocation2 + $0x8] sm:$0x1] }
  0xc3   :  { %v649_v19 = vmin.f32 %v578_v15, 0.0  ;;  %v645_v22 = vmax.f32 %v578_v15, 0.0 }
  0xc4   :  { %v598_v16 = vpop.f32.mrf.mxu3 }
  0xc5   :  { %v654_v23 = vmul.f32 %v4511_v17, %v649_v19  ;;  %v560_v24 = vpop.f32.mrf.mxu1  ;;  %v544_v26 = vpop.f32.mrf.mxu0 }
  0xc6   :  { %v561_v28 = vadd.f32 %v560_v24, %v542_v20  ;;  %v545_v40 = vadd.f32 %v544_v26, %v4491_v62 }
  0xc7   :  { %v658_v27 = vadd.f32 %v654_v23, %v645_v22  ;;  %v1214_v22 = vld [vmem:[#allocation3 + $0x28] sm:$0x66] }
  0xc8   :  { %v579_v31 = vpop.f32.mrf.mxu2  ;;  %v1215_v25 = vsel %vm1210_vm15, 0, %v1214_v22 }
  0xc9   :  { %v662_v32 = vpack.c.bf16 %v658_v27, %v658_v27  ;;  %v580_v33 = vadd.f32 %v579_v31, %v561_v28  ;;  %1216 = vst [vmem:[#allocation3 + $0x28] sm:$0x66] %v1215_v25 }
  0xcb   :  { %v667_v36 = vshrl.u32 %v662_v32, 16  ;;  %v650_v39 = vmin.f32 %v580_v33, 0.0  ;;  %v670_v43 = vshll.u32 %v662_v32, 16  ;;  %v646_v45 = vmax.f32 %v580_v33, 0.0  ;;  %v712_v32 = vld [vmem:[#allocation2 + $0xc] sm:$0xf] }
  0xcd   :  { %v669_v42 = vrot.slane %v667_v36, 7  ;;  %v655_v46 = vmul.f32 %v4511_v17, %v650_v39  ;;  %v563_v47 = vpop.f32.mrf.mxu1  ;;  %v546_v50 = vpop.f32.mrf.mxu0  ;;  %v599_v39 = vadd.f32 %v598_v16, %v4549_v63 }
  0xce   :  { %v564_v53 = vadd.f32 %v563_v47, %v545_v40  ;;  %v547_v2 = vadd.f32 %v546_v50, %v4491_v62 }
  0xcf   :  { %v672_v51 = vor.u32 %v670_v43, %v669_v42  ;;  %v659_v52 = vadd.f32 %v655_v46, %v646_v45  ;;  %v673_v7 = vrot.slane %v669_v42, 4  ;;  %v601_v45 = vpop.f32.mrf.mxu3 }
  0xd0   :  { %v582_v54 = vpop.f32.mrf.mxu2 }
  0xd1   :  { %v706_v56 = vsel %vm4453_vm8, %v672_v51, %v4472_v29  ;;  %v663_v58 = vpack.c.bf16 %v659_v52, %v659_v52  ;;  %v583_v59 = vadd.f32 %v582_v54, %v564_v53 }
  0xd2   :  { %707 = vst [vmem:[#allocation2] sm:$0xf] %v706_v56 }
  0xd3   :  { %v675_v0 = vshrl.u32 %v663_v58, 16  ;;  %v651_v1 = vmin.f32 %v583_v59, 0.0  ;;  %v678_v4 = vshll.u32 %v663_v58, 16  ;;  %v647_v29 = vmax.f32 %v583_v59, 0.0 }
  0xd5   :  { %v677_v3 = vrot.slane %v675_v0, 7  ;;  %v656_v5 = vmul.f32 %v4511_v17, %v651_v1  ;;  %v565_v6 = vpop.f32.mrf.mxu1  ;;  %v615_v11 = vpop.f32.mrf.mxu0  ;;  %v602_v0 = vadd.f32 %v601_v45, %v4549_v63 }
  0xd6   :  { %v566_v14 = vadd.f32 %v565_v6, %v547_v2  ;;  %v616_v21 = vadd.f32 %v615_v11, %v597_v9 }
  0xd7   :  { %v680_v12 = vor.u32 %v678_v4, %v677_v3  ;;  %v682_v13 = vrot.slane %v677_v3, 4  ;;  %v660_v57 = vadd.f32 %v656_v5, %v647_v29 }
  0xd8   :  { %v584_v15 = vpop.f32.mrf.mxu2 }
  0xd9   :  { %v681_v62 = vsel %vm4447_vm7, %v673_v7, %v680_v12  ;;  %v710_v18 = vsel %vm4420_vm2, %v682_v13, %v709_v8  ;;  %v664_v19 = vpack.c.bf16 %v660_v57, %v660_v57  ;;  %v585_v20 = vadd.f32 %v584_v15, %v566_v14  ;;  %v4118_v51 = vld [vmem:[#allocation2] sm:$0xe]  ;;  %v1269_v13 = vld [vmem:[#allocation3] sm:$0xe]  ;;  %v4049_v12 = vld [vmem:[#allocation10 + $0x1c0] sm:$0xff] }
  0xda   :  { %708 = vst [vmem:[#allocation2 + $0x4] sm:$0xf] %v681_v62 }
  0xdb   :  { %711 = vst [vmem:[#allocation2 + $0x8] sm:$0x1] %v710_v18  ;;  %v684_v23 = vshrl.u32 %v664_v19, 16  ;;  %v652_v24 = vmin.f32 %v585_v20, 0.0  ;;  %v687_v27 = vshll.u32 %v664_v19, 16  ;;  %v648_v28 = vmax.f32 %v585_v20, 0.0 }
  0xdd   :  { %v686_v26 = vrot.slane %v684_v23, 7  ;;  %v657_v30 = vmul.f32 %v4511_v17, %v652_v24  ;;  %v634_v31 = vpop.f32.mrf.mxu1  ;;  %v617_v34 = vpop.f32.mrf.mxu0 }
  0xde   :  { %v4564_v33 = vadd.f32 %v634_v31, %v616_v21  ;;  %v618_v46 = vadd.f32 %v617_v34, %v599_v39  ;;  %v603_v24 = vpop.f32.mrf.mxu3 }
  0xdf   :  { %v689_v38 = vor.u32 %v687_v27, %v686_v26  ;;  %v661_v36 = vadd.f32 %v657_v30, %v648_v28  ;;  %v690_v59 = vrot.slane %v686_v26, 4  ;;  %v4079_v27 = vld [vmem:[#allocation10 + $0x2b0] sm:$0xff] }
  0xe0   :  { %v1217_v61 = vpack.c.bf16 %v4564_v33, %v4564_v33 }
  0xe1   :  { %v713_v35 = vsel %vm4453_vm8, %v689_v38, %v712_v32  ;;  %v665_v40 = vpack.c.bf16 %v661_v36, %v661_v36  ;;  %v4114_v41 = vld [vmem:[#allocation2] sm:$0xff]   ;;  %vm1267_vm8 = vcmask 1043457   ;;  %v604_v38 = vadd.f32 %v603_v24, %v4549_v63 }
  0xe2   :  { %v4117_v42 = vld [vmem:[#allocation2] sm:$0xf0]  ;;  %714 = vst [vmem:[#allocation2 + $0xc] sm:$0xf] %v713_v35  ;;  %v1224_v17 = vshrl.u32 %v1217_v61, 16  ;;  %v1227_v43 = vshll.u32 %v1217_v61, 16  ;;  %989 = vmatmul.bf16.vlgmr.msrb.gmra.mxu2 %v4114_v41  ;;  %vm4580_vm15 = vmand %vm1267_vm8, %vm1205_vm4 }
  0xe3   :  { %v692_v47 = vshrl.u32 %v665_v40, 16  ;;  %v748_v49 = vshll.u32 %v4114_v41, 16  ;;  %v723_v50 = vld [vmem:[#allocation2 + $0x8] sm:$0x1]  ;;  %v4119_v55 = vor.u32 %v4118_v51, %v4117_v42  ;;  %v695_v44 = vshll.u32 %v665_v40, 16 }
  0xe4   :  { %v1226_v52 = vrot.slane %v1224_v17, 6  ;;  %v1229_v53 = vrot.slane %v1227_v43, 7  ;;  %v741_v54 = vunpack.c.l.b16 %v723_v50  ;;  %v746_v15 = vshrl.u32 %v4114_v41, 16  ;;  %v1273_v61 = vld [vmem:[#allocation3 + $0x10] sm:$0x3] }
  0xe5   :  { %v694_v56 = vrot.slane %v692_v47, 7  ;;  %v636_v58 = vpop.f32.mrf.mxu1  ;;  %v620_v3 = vpop.f32.mrf.mxu0  ;;  %v750_v6 = vrot.slane %v748_v49, 1  ;;  %v777_v9 = vrot.slane %v4119_v55, 1 }
  0xe6   :  { %v4572_v1 = vadd.f32 %v636_v58, %v618_v46  ;;  %v743_v2 = vpack.c.b16 %v741_v54, %v741_v54  ;;  %v1230_v5 = vor.u32 %v1229_v53, %v1226_v52  ;;  %v621_v20 = vadd.f32 %v620_v3, %v602_v0 }
  0xe7   :  { %v697_v4 = vor.u32 %v695_v44, %v694_v56  ;;  %v699_v29 = vrot.slane %v694_v56, 4  ;;  %v751_v21 = vor.u32 %v750_v6, %v746_v15  ;;  %v1276_v56 = vld [vmem:[#allocation3 + $0x18] sm:$0xe]  ;;  %v1280_v15 = vld [vmem:[#allocation3 + $0x28] sm:$0x3] }
  0xe8   :  { %v1218_v7 = vpack.c.bf16 %v4572_v1, %v4572_v1  ;;  %v4135_v8 = vpack.i.bf16 %v4572_v1, %v4564_v33  ;;  %v778_v11 = vrot.slane %v743_v2, 1  ;;  %v753_v16 = vshll.u32 %v743_v2, 16 }
  0xe9   :  { %v698_v57 = vsel %vm4447_vm7, %v690_v59, %v697_v4  ;;  %v717_v14 = vsel %vm4420_vm2, %v699_v29, %v716_v60  ;;  %v1270_v37 = vsel %vm4580_vm15, %v1230_v5, %v1269_v13  ;;  %vm4595_vm2 = vmor %vm1192_vm12, %vm1221_vm6  ;;  %v1231_v28 = vrot.slane %v1230_v5, 4  ;;  %v4230_v34 = vld [vmem:[#allocation2 + $0xc] sm:$0xe] }
  0xea   :  { %715 = vst [vmem:[#allocation2 + $0x10] sm:$0xf] %v698_v57  ;;  %v1233_v62 = vshrl.u32 %v1218_v7, 16  ;;  %v1236_v18 = vshll.u32 %v1218_v7, 16  ;;  %4136 = vrot.lane.b32.xlu0 %v4135_v8, %s4341_s9  ;;  %v779_v19 = vsel %vm227_vm9, %v777_v9, %v778_v11  ;;  %v755_v22 = vrot.slane %v753_v16, 1 }
  0xeb   :  { %718 = vst [vmem:[#allocation2 + $0x14] sm:$0x1] %v717_v14  ;;  %1027 = vmatmul.bf16.vlgmr.msra.gmra.mxu0 %v779_v19  ;;  %v1042_v19 = vlaneseq }
  0xec   :  { %v1235_v48 = vrot.slane %v1233_v62, 6  ;;  %v1238_v23 = vrot.slane %v1236_v18, 7  ;;  %1271 = vst [vmem:[#allocation3] sm:$0xe] %v1270_v37  ;;  %v756_v26 = vsel %vm194_vm10, %v751_v21, %v755_v22 }
  0xed   :  { %v639_v25 = vpop.f32.mrf.mxu1  ;;  %1008 = vmatmul.bf16.vlgmr.msrb.gmra.mxu3 %v756_v26  ;;  %v622_v32 = vpop.f32.mrf.mxu0  ;;  %v4625_v21 = vand.u32 127, %v1042_v19 }
  0xee   :  { %v1239_v30 = vor.u32 %v1238_v23, %v1235_v48  ;;  %v4599_v31 = vadd.f32 %v639_v25, %v621_v20  ;;  %v623_v40 = vadd.f32 %v622_v32, %v604_v38 }
  0xef   :  { %v1076_v22 = vand.u32 7, %v4625_v21 }
  0xf0   :  { %v1241_v36 = vrot.slane %v1239_v30, 4  ;;  %v1219_v39 = vpack.c.bf16 %v4599_v31, %v4599_v31  ;;  %v1240_v35 = vsel %vm4595_vm2, %v1231_v28, %v1239_v30 }
  0xf1   :  { %v721_v41 = vld [vmem:[#allocation2 + $0xc] sm:$0xff]   ;;  %1272 = vst [vmem:[#allocation3 + $0x8] sm:$0xf] %v1240_v35  ;;  %vm4628_vm7 = vcmp.lt.s32.totalorder %v1076_v22, 4 }
  0xf2   :  { %v4229_v42 = vld [vmem:[#allocation2 + $0xc] sm:$0xf0]  ;;  %v1243_v17 = vshrl.u32 %v1219_v39, 16  ;;  %v1246_v43 = vshll.u32 %v1219_v39, 16  ;;  %4141 = vrot.lane.b32.xlu0 %v4135_v8, %s4336_s22  ;;  %v724_v45 = vld [vmem:[#allocation2 + $0x14] sm:$0x1]  ;;  %v1274_v63 = vsel %vm4495_vm14, %v1241_v36, %v1273_v61  ;;  %994 = vmatmul.bf16.gmra.mxu2 %v721_v41 }
  0xf3   :  { %v742_v46 = vunpack.c.l.b16 %v724_v45  ;;  %v4231_v50 = vor.u32 %v4230_v34, %v4229_v42  ;;  %1275 = vst [vmem:[#allocation3 + $0x10] sm:$0x3] %v1274_v63  ;;  %v760_v58 = vshll.u32 %v721_v41, 16  ;;  %v758_v3 = vshrl.u32 %v721_v41, 16  ;;  %v4195_v39 = vld [vmem:[%s4922_s4] ss:$0 sm:$0xff] }
  0xf4   :  { %v1245_v47 = vrot.slane %v1243_v17, 6  ;;  %v1248_v49 = vrot.slane %v1246_v43, 7 }
  0xf5   :  { %v641_v51 = vpop.f32.mrf.mxu1  ;;  %v744_v52 = vpack.c.b16 %v742_v46, %v742_v46  ;;  %v780_v55 = vrot.slane %v4231_v50, 1  ;;  %v762_v4 = vrot.slane %v760_v58, 1 }
  0xf6   :  { %v1249_v53 = vor.u32 %v1248_v49, %v1245_v47  ;;  %v4609_v54 = vadd.f32 %v641_v51, %v623_v40 }
  0xf7   :  { %v781_v44 = vrot.slane %v744_v52, 1  ;;  %v765_v59 = vshll.u32 %v744_v52, 16  ;;  %v763_v7 = vor.u32 %v762_v4, %v758_v3 }
  0xf8   :  { %v1220_v60 = vpack.c.bf16 %v4609_v54, %v4609_v54  ;;  %v4145_v0 = vpack.i.bf16 %v4609_v54, %v4599_v31  ;;  %v1277_v29 = vsel %vm4580_vm15, %v1249_v53, %v1276_v56  ;;  %v1250_v57 = vrot.slane %v1249_v53, 4 }
  0xf9   :  { %v782_v2 = vsel %vm227_vm9, %v780_v55, %v781_v44  ;;  %1278 = vst [vmem:[#allocation3 + $0x18] sm:$0xe] %v1277_v29  ;;  %v767_v8 = vrot.slane %v765_v59, 1 }
  0xfa   :  { %v1252_v5 = vshrl.u32 %v1220_v60, 16  ;;  %v1255_v6 = vshll.u32 %v1220_v60, 16  ;;  %4146 = vrot.lane.b32.xlu1 %v4145_v0, %s4341_s9 }
  0xfb   :  { %1032 = vmatmul.bf16.gmra.mxu0 %v782_v2  ;;  %v768_v13 = vsel %vm194_vm10, %v763_v7, %v767_v8  ;;  %v1125_v7 = vand.u32 3, %v4625_v21 }
  0xfc   :  { %v1254_v9 = vrot.slane %v1252_v5, 6  ;;  %v1257_v11 = vrot.slane %v1255_v6, 7 }
  0xfd   :  { %1013 = vmatmul.bf16.gmra.mxu3 %v768_v13  ;;  %vm4654_vm12 = vcmp.lt.s32.totalorder %v1125_v7, 2  ;;  %v4018_v7 = vld [vmem:[#allocation10 + $0xc8] sm:$0xff] }
  0xfe   :  { %v1258_v14 = vor.u32 %v1257_v11, %v1254_v9 }
 0x100   :  { %v1260_v16 = vrot.slane %v1258_v14, 4  ;;  %v1259_v62 = vsel %vm4595_vm2, %v1250_v57, %v1258_v14 }
 0x101   :  { %1279 = vst [vmem:[#allocation3 + $0x20] sm:$0xf] %v1259_v62 }
 0x102   :  { %4151 = vrot.lane.b32.xlu1 %v4145_v0, %s4336_s22  ;;  %v1281_v18 = vsel %vm4495_vm14, %v1260_v16, %v1280_v15  ;;  %s4342_s22 = smov 126  }
 0x103   :  { %1282 = vst [vmem:[#allocation3 + $0x28] sm:$0x3] %v1281_v18 }
 0x15c   :  { %v4137_v20 = vpop.permute.xlu0 %4136 }
 0x15d   :  { %v4139_v23 = vunpack.i.h.bf16 %v4137_v20  ;;  %v4138_v24 = vunpack.i.l.bf16 %v4137_v20 }
 0x164   :  { %v4142_v48 = vpop.permute.xlu0 %4141 }
 0x165   :  { %v4144_v25 = vunpack.i.h.bf16 %v4142_v48  ;;  %v4143_v26 = vunpack.i.l.bf16 %v4142_v48  ;;  %v990_v36 = vpop.f32.mrf.mxu2 }
 0x166   :  { %v991_v40 = vadd.f32 %v4195_v39, %v990_v36  ;;  %v3999_v36 = vld [vmem:[#allocation10 + $0x30] sm:$0xff] }
 0x167   :  { %v1085_v28 = vsel %vm4628_vm7, %v4138_v24, %v4143_v26  ;;  %v1086_v30 = vsel %vm4628_vm7, %v4139_v23, %v4144_v25 }
 0x168   :  { %v1089_v32 = vmax.f32 %v4564_v33, %v1085_v28  ;;  %v1090_v34 = vmax.f32 %v4572_v1, %v1086_v30  ;;  %v1028_v35 = vpop.f32.mrf.mxu0 }
 0x16a   :  { %v4155_v38 = vpack.i.bf16 %v1090_v34, %v1089_v32 }
 0x16c   :  { %v4147_v61 = vpop.permute.xlu1 %4146  ;;  %4156 = vrot.lane.b32.xlu2 %v4155_v38, %s4342_s22 }
 0x16d   :  { %v4149_v45 = vunpack.i.h.bf16 %v4147_v61  ;;  %v4148_v46 = vunpack.i.l.bf16 %v4147_v61  ;;  %v992_v63 = vpop.f32.mrf.mxu2  ;;  %v4016_v61 = vld [vmem:[#allocation10 + $0xb8] sm:$0xff] }
 0x16e   :  { %v993_v52 = vadd.f32 %v4195_v39, %v992_v63  ;;  %2622 = vmatpush.bf16.msra.mxu3 %v4016_v61  ;;  %v4014_v63 = vld [vmem:[#allocation10 + $0xa8] sm:$0xff]  ;;  %v1331_v61 = vld [vmem:[#allocation3 + $0x4] sm:$0xe] }
 0x170   :  { %v1009_v41 = vpop.f32.mrf.mxu3  ;;  %v1030_v56 = vpop.f32.mrf.mxu0 }
 0x171   :  { %v1010_v42 = vadd.f32 %v1009_v41, %v991_v40  ;;  %v3998_v40 = vld [vmem:[#allocation10 + $0x28] sm:$0xff] }
 0x172   :  { %v4006_v41 = vld [vmem:[#allocation10 + $0x68] sm:$0xff] }
 0x173   :  { %v4641_v17 = vadd.f32 %v1028_v35, %v1010_v42  ;;  %v4024_v35 = vld [vmem:[#allocation10 + $0xf8] sm:$0xff]  ;;  %v4015_v42 = vld [vmem:[#allocation10 + $0xb0] sm:$0xff] }
 0x174   :  { %v4152_v43 = vpop.permute.xlu1 %4151  ;;  %4161 = vrot.lane.b32.xlu2 %v4155_v38, %s4343_s23  ;;  %v4008_v38 = vld [vmem:[#allocation10 + $0x78] sm:$0xff]  ;;  %2641 = vmatpush.bf16.msrb.mxu0 %v4024_v35 }
 0x175   :  { %v4154_v47 = vunpack.i.h.bf16 %v4152_v43  ;;  %v4153_v49 = vunpack.i.l.bf16 %v4152_v43  ;;  %v995_v0 = vpop.f32.mrf.mxu2  ;;  %2603 = vmatpush.bf16.msra.mxu2 %v4008_v38  ;;  %v4023_v43 = vld [vmem:[#allocation10 + $0xf0] sm:$0xff]  ;;  %2623 = vmatpush.bf16.msra.mxu3 %v4015_v42 }
 0x176   :  { %v996_v2 = vadd.f32 %v4195_v39, %v995_v0  ;;  %v4007_v39 = vld [vmem:[#allocation10 + $0x70] sm:$0xff] }
 0x177   :  { %v1087_v50 = vsel %vm4628_vm7, %v4148_v46, %v4153_v49  ;;  %v1088_v51 = vsel %vm4628_vm7, %v4149_v45, %v4154_v47  ;;  %v3997_v45 = vld [vmem:[#allocation10 + $0x20] sm:$0xff]  ;;  %v4022_v47 = vld [vmem:[#allocation10 + $0xe8] sm:$0xff]  ;;  %v3996_v49 = vld [vmem:[#allocation10 + $0x18] sm:$0xff] }
 0x178   :  { %v1091_v53 = vmax.f32 %v4599_v31, %v1087_v50  ;;  %v1092_v55 = vmax.f32 %v4609_v54, %v1088_v51  ;;  %v1011_v44 = vpop.f32.mrf.mxu3  ;;  %v1033_v29 = vpop.f32.mrf.mxu0  ;;  %v4005_v46 = vld [vmem:[#allocation10 + $0x60] sm:$0xff]  ;;  %2642 = vmatpush.bf16.msrb.mxu0 %v4023_v43  ;;  %v4004_v50 = vld [vmem:[#allocation10 + $0x58] sm:$0xff]  ;;  %v4011_v0 = vld [vmem:[#allocation10 + $0x90] sm:$0xff] }
 0x179   :  { %v1012_v58 = vadd.f32 %v1011_v44, %v993_v52  ;;  %2604 = vmatpush.bf16.msra.mxu2 %v4007_v39  ;;  %2624 = vmatpush.bf16.msra.mxu3 %v4014_v63  ;;  %v4013_v51 = vld [vmem:[#allocation10 + $0xa0] sm:$0xff]  ;;  %v4020_v44 = vld [vmem:[#allocation10 + $0xd8] sm:$0xff] }
 0x17a   :  { %v4170_v59 = vpack.i.bf16 %v1092_v55, %v1091_v53  ;;  %v4021_v52 = vld [vmem:[#allocation10 + $0xe0] sm:$0xff]  ;;  %v4040_v43 = vld [vmem:[#allocation10 + $0x178] sm:$0xff] }
 0x17b   :  { %v4649_v60 = vadd.f32 %v1030_v56, %v1012_v58  ;;  %v4012_v56 = vld [vmem:[#allocation10 + $0x98] sm:$0xff]  ;;  %v3994_v58 = vld [vmem:[#allocation10 + $0x8] sm:$0xff] }
 0x17c   :  { %4171 = vrot.lane.b32.xlu1 %v4170_v59, %s4343_s23  ;;  %4166 = vrot.lane.b32.xlu0 %v4170_v59, %s4342_s22  ;;  %v4002_v59 = vld [vmem:[#allocation10 + $0x48] sm:$0xff] }
 0x17d   :  { %2605 = vmatpush.bf16.msra.mxu2 %v4006_v41  ;;  %2643 = vmatpush.bf16.msrb.mxu0 %v4022_v47  ;;  %v1335_v41 = vld [vmem:[#allocation3 + $0x14] sm:$0x3]  ;;  %v4039_v47 = vld [vmem:[#allocation10 + $0x170] sm:$0xff] }
 0x17e   :  { %2625 = vmatpush.bf16.msra.mxu3 %v4013_v51  ;;  %v4056_v51 = vld [vmem:[#allocation10 + $0x1f8] sm:$0xff] }
 0x180   :  { %v1014_v3 = vpop.f32.mrf.mxu3 }
 0x181   :  { %v1015_v4 = vadd.f32 %v1014_v3, %v996_v2  ;;  %2606 = vmatpush.bf16.msra.mxu2 %v4005_v46  ;;  %2644 = vmatpush.bf16.msrb.mxu0 %v4021_v52  ;;  %v4019_v2 = vld [vmem:[#allocation10 + $0xd0] sm:$0xff]  ;;  %v3993_v3 = vld [vmem:[#allocation10] sm:$0xff]  ;;  %v4038_v52 = vld [vmem:[#allocation10 + $0x168] sm:$0xff] }
 0x182   :  { %2626 = vmatpush.bf16.msra.mxu3 %v4012_v56  ;;  %v4047_v56 = vld [vmem:[#allocation10 + $0x1b0] sm:$0xff] }
 0x183   :  { %v4651_v5 = vadd.f32 %v1033_v29, %v1015_v4  ;;  %v4001_v4 = vld [vmem:[#allocation10 + $0x40] sm:$0xff]  ;;  %v1174_v29 = vand.u32 1, %v4625_v21 }
 0x184   :  { %v4017_v21 = vld [vmem:[#allocation10 + $0xc0] sm:$0xff] }
 0x185   :  { %2607 = vmatpush.bf16.msra.mxu2 %v4004_v50  ;;  %2645 = vmatpush.bf16.msrb.mxu0 %v4020_v44  ;;  %vm4679_vm0 = vcmp.lt.s32.totalorder %v1174_v29, 1  ;;  %v4048_v50 = vld [vmem:[#allocation10 + $0x1b8] sm:$0xff]  ;;  %v4055_v44 = vld [vmem:[#allocation10 + $0x1f0] sm:$0xff] }
 0x186   :  { %2627 = vmatpush.bf16.msra.mxu3 %v4011_v0 }
 0x189   :  { %2646 = vmatpush.bf16.msrb.mxu0 %v4019_v2 }
 0x18d   :  { %2647 = vmatpush.bf16.msrb.mxu0 %v4018_v7  ;;  %v4037_v7 = vld [vmem:[#allocation10 + $0x160] sm:$0xff] }
 0x191   :  { %2648 = vmatpush.bf16.msrb.mxu0 %v4017_v21 }
 0x195   :  { %2717 = vmatpush.bf16.msra.mxu0 %v4056_v51 }
 0x199   :  { %2718 = vmatpush.bf16.msra.mxu0 %v4055_v44  ;;  %v4026_v44 = vld [vmem:[#allocation10 + $0x108] sm:$0xff] }
 0x1c6   :  { %v4157_v6 = vpop.permute.xlu2 %4156 }
 0x1c7   :  { %v4159_v11 = vunpack.i.h.bf16 %v4157_v6  ;;  %v4158_v13 = vunpack.i.l.bf16 %v4157_v6  ;;  %v4010_v6 = vld [vmem:[#allocation10 + $0x88] sm:$0xff] }
 0x1c8   :  { %2628 = vmatpush.bf16.msra.mxu3 %v4010_v6 }
 0x1ce   :  { %v4162_v9 = vpop.permute.xlu2 %4161 }
 0x1cf   :  { %v4164_v57 = vunpack.i.h.bf16 %v4162_v9  ;;  %v4163_v14 = vunpack.i.l.bf16 %v4162_v9  ;;  %v4034_v9 = vld [vmem:[#allocation10 + $0x148] sm:$0xff] }
 0x1d1   :  { %v1134_v15 = vsel %vm4654_vm12, %v4158_v13, %v4163_v14  ;;  %v1135_v16 = vsel %vm4654_vm12, %v4159_v11, %v4164_v57 }
 0x1d2   :  { %v4662_v62 = vmax.f32 %v1089_v32, %v1134_v15  ;;  %v4664_v18 = vmax.f32 %v1090_v34, %v1135_v16  ;;  %v4000_v34 = vld [vmem:[#allocation10 + $0x38] sm:$0xff]  ;;  %v4009_v16 = vld [vmem:[#allocation10 + $0x80] sm:$0xff] }
 0x1d3   :  { %2584 = vmatpush.bf16.msra.mxu1 %v4000_v34  ;;  %2629 = vmatpush.bf16.msra.mxu3 %v4009_v16 }
 0x1d4   :  { %v4180_v19 = vpack.i.bf16 %v4664_v18, %v4662_v62 }
 0x1d6   :  { %4181 = vrot.lane.b32.xlu0 %v4180_v19, %s4344_s24  ;;  %4176 = vrot.lane.b32.xlu2 %v4180_v19, %s4345_s3 }
 0x1d7   :  { %2585 = vmatpush.bf16.msra.mxu1 %v3999_v36  ;;  %2698 = vmatpush.bf16.msrb.mxu3 %v4048_v50 }
 0x1db   :  { %2586 = vmatpush.bf16.msra.mxu1 %v3998_v40  ;;  %2699 = vmatpush.bf16.msrb.mxu3 %v4047_v56 }
 0x1df   :  { %2587 = vmatpush.bf16.msra.mxu1 %v3997_v45  ;;  %v4032_v45 = vld [vmem:[#allocation10 + $0x138] sm:$0xff] }
 0x1e3   :  { %2588 = vmatpush.bf16.msra.mxu1 %v3996_v49  ;;  %v4031_v49 = vld [vmem:[#allocation10 + $0x130] sm:$0xff] }
 0x1ee   :  { %v4172_v20 = vpop.permute.xlu1 %4171  ;;  %v4167_v22 = vpop.permute.xlu0 %4166 }
 0x1ef   :  { %v4174_v37 = vunpack.i.h.bf16 %v4172_v20  ;;  %v4173_v48 = vunpack.i.l.bf16 %v4172_v20  ;;  %v4169_v23 = vunpack.i.h.bf16 %v4167_v22  ;;  %v4168_v24 = vunpack.i.l.bf16 %v4167_v22 }
 0x1f1   :  { %v1137_v25 = vsel %vm4654_vm12, %v4169_v23, %v4174_v37  ;;  %v1136_v26 = vsel %vm4654_vm12, %v4168_v24, %v4173_v48 }
 0x1f2   :  { %v4672_v28 = vmax.f32 %v1092_v55, %v1137_v25  ;;  %v4674_v30 = vmax.f32 %v1091_v53, %v1136_v26  ;;  %v3995_v53 = vld [vmem:[#allocation10 + $0x10] sm:$0xff] }
 0x1f3   :  { %v4003_v55 = vld [vmem:[#allocation10 + $0x50] sm:$0xff]  ;;  %2589 = vmatpush.bf16.msra.mxu1 %v3995_v53  ;;  %v4030_v53 = vld [vmem:[#allocation10 + $0x128] sm:$0xff] }
 0x1f4   :  { %v4185_v32 = vpack.i.bf16 %v4672_v28, %v4674_v30  ;;  %2608 = vmatpush.bf16.msra.mxu2 %v4003_v55 }
 0x1f6   :  { %4186 = vrot.lane.b32.xlu1 %v4185_v32, %s4345_s3  ;;  %4191 = vrot.lane.b32.xlu2 %v4185_v32, %s4344_s24 }
 0x1f7   :  { %2590 = vmatpush.bf16.msra.mxu1 %v3994_v58 }
 0x1f8   :  { %2609 = vmatpush.bf16.msra.mxu2 %v4002_v59 }
 0x1fb   :  { %2591 = vmatpush.bf16.msra.mxu1 %v3993_v3 }
 0x1fc   :  { %2610 = vmatpush.bf16.msra.mxu2 %v4001_v4 }
 0x1ff   :  { %2660 = vmatpush.bf16.msrb.mxu1 %v4032_v45  ;;  %v4027_v45 = vld [vmem:[#allocation10 + $0x110] sm:$0xff] }
 0x200   :  { %2679 = vmatpush.bf16.msrb.mxu2 %v4040_v43  ;;  %v4035_v43 = vld [vmem:[#allocation10 + $0x150] sm:$0xff] }
 0x203   :  { %2661 = vmatpush.bf16.msrb.mxu1 %v4031_v49 }
 0x204   :  { %2680 = vmatpush.bf16.msrb.mxu2 %v4039_v47 }
 0x207   :  { %2662 = vmatpush.bf16.msrb.mxu1 %v4030_v53  ;;  %v4052_v53 = vld [vmem:[#allocation10 + $0x1d8] sm:$0xff] }
 0x208   :  { %2681 = vmatpush.bf16.msrb.mxu2 %v4038_v52  ;;  %v4044_v52 = vld [vmem:[#allocation10 + $0x198] sm:$0xff] }
 0x20c   :  { %2682 = vmatpush.bf16.msrb.mxu2 %v4037_v7 }
 0x230   :  { %v4177_v8 = vpop.permute.xlu2 %4176 }
 0x231   :  { %v4179_v13 = vunpack.i.h.bf16 %v4177_v8  ;;  %v4178_v57 = vunpack.i.l.bf16 %v4177_v8  ;;  %v4029_v8 = vld [vmem:[#allocation10 + $0x120] sm:$0xff] }
 0x232   :  { %2663 = vmatpush.bf16.msrb.mxu1 %v4029_v8 }
 0x248   :  { %v4182_v11 = vpop.permute.xlu0 %4181 }
 0x249   :  { %v4184_v14 = vunpack.i.h.bf16 %v4182_v11  ;;  %v4183_v15 = vunpack.i.l.bf16 %v4182_v11 }
 0x24b   :  { %v1183_v19 = vsel %vm4679_vm0, %v4178_v57, %v4183_v15  ;;  %v1184_v20 = vsel %vm4679_vm0, %v4179_v13, %v4184_v14 }
 0x24c   :  { %v1187_v22 = vmax.f32 %v4662_v62, %v1183_v19  ;;  %v1188_v37 = vmax.f32 %v4664_v18, %v1184_v20  ;;  %v4046_v19 = vld [vmem:[#allocation10 + $0x1a8] sm:$0xff] }
 0x24d   :  { %2700 = vmatpush.bf16.msrb.mxu3 %v4046_v19 }
 0x24e   :  { %v1283_v48 = vpack.c.bf16 %v1187_v22, %v1187_v22  ;;  %v1284_v23 = vpack.c.bf16 %v1188_v37, %v1188_v37  ;;  %v4036_v37 = vld [vmem:[#allocation10 + $0x158] sm:$0xff] }
 0x24f   :  { %2683 = vmatpush.bf16.msrb.mxu2 %v4036_v37  ;;  %v4072_v37 = vld [vmem:[#allocation10 + $0x278] sm:$0xff] }
 0x250   :  { %v1288_v24 = vshrl.u32 %v1283_v48, 16  ;;  %v1291_v25 = vshll.u32 %v1283_v48, 16  ;;  %v1297_v26 = vshrl.u32 %v1284_v23, 16  ;;  %v1300_v32 = vshll.u32 %v1284_v23, 16  ;;  %v4192_v15 = vpop.permute.xlu2 %4191  ;;  %v4054_v48 = vld [vmem:[#allocation10 + $0x1e8] sm:$0xff]  ;;  %v4028_v23 = vld [vmem:[#allocation10 + $0x118] sm:$0xff] }
 0x251   :  { %2719 = vmatpush.bf16.msra.mxu0 %v4054_v48  ;;  %2664 = vmatpush.bf16.msrb.mxu1 %v4028_v23 }
 0x252   :  { %v1290_v34 = vrot.slane %v1288_v24, 6  ;;  %v1293_v38 = vrot.slane %v1291_v25, 7  ;;  %v1299_v36 = vrot.slane %v1297_v26, 6  ;;  %v1302_v39 = vrot.slane %v1300_v32, 7 }
 0x253   :  { %2684 = vmatpush.bf16.msrb.mxu2 %v4035_v43 }
 0x254   :  { %v1294_v35 = vor.u32 %v1293_v38, %v1290_v34  ;;  %v1303_v40 = vor.u32 %v1302_v39, %v1299_v36  ;;  %v4045_v34 = vld [vmem:[#allocation10 + $0x1a0] sm:$0xff]  ;;  %v4194_v38 = vunpack.i.h.bf16 %v4192_v15  ;;  %v4193_v36 = vunpack.i.l.bf16 %v4192_v15  ;;  %v1338_v15 = vld [vmem:[#allocation3 + $0x1c] sm:$0xe] }
 0x255   :  { %2701 = vmatpush.bf16.msrb.mxu3 %v4045_v34  ;;  %2665 = vmatpush.bf16.msrb.mxu1 %v4027_v45 }
 0x256   :  { %v1295_v42 = vrot.slane %v1294_v35, 4  ;;  %v1305_v62 = vrot.slane %v1303_v40, 4  ;;  %v1332_v18 = vsel %vm4580_vm15, %v1294_v35, %v1331_v61 }
 0x257   :  { %1333 = vst [vmem:[#allocation3 + $0x4] sm:$0xe] %v1332_v18  ;;  %v4053_v18 = vld [vmem:[#allocation10 + $0x1e0] sm:$0xff]  ;;  %2685 = vmatpush.bf16.msrb.mxu2 %v4034_v9 }
 0x258   :  { %v1304_v46 = vsel %vm4595_vm2, %v1295_v42, %v1303_v40  ;;  %v1336_v63 = vsel %vm4495_vm14, %v1305_v62, %v1335_v41  ;;  %2720 = vmatpush.bf16.msra.mxu0 %v4053_v18  ;;  %v4061_v18 = vld [vmem:[#allocation10 + $0x220] sm:$0xff] }
 0x259   :  { %1334 = vst [vmem:[#allocation3 + $0xc] sm:$0xf] %v1304_v46  ;;  %2702 = vmatpush.bf16.msrb.mxu3 %v4044_v52  ;;  %2666 = vmatpush.bf16.msrb.mxu1 %v4026_v44 }
 0x25a   :  { %1337 = vst [vmem:[#allocation3 + $0x14] sm:$0x3] %v1336_v63 }
 0x25c   :  { %2721 = vmatpush.bf16.msra.mxu0 %v4052_v53 }
 0x25e   :  { %v1345_v55 = vld [vmem:[#allocation3] sm:$0xff] }
 0x25f   :  { %v1365_v59 = vunpack.c.l.b16 %v1345_v55  ;;  %v1366_v2 = vunpack.c.h.b16 %v1345_v55 }
 0x260   :  { %v1346_v58 = vld [vmem:[#allocation3 + $0x8] sm:$0xff] }
 0x261   :  { %v4695_v0 = vunpack.c.l.b16 %v1346_v58  ;;  %v4697_v3 = vunpack.c.h.b16 %v1346_v58  ;;  %v1349_v4 = vld [vmem:[#allocation3 + $0x10] sm:$0x11]  ;;  %v4043_v58 = vld [vmem:[#allocation10 + $0x190] sm:$0xff] }
 0x262   :  { %v1383_v29 = vunpack.c.l.b16 %v1349_v4  ;;  %v1384_v6 = vunpack.c.h.b16 %v1349_v4  ;;  %2703 = vmatpush.bf16.msrb.mxu3 %v4043_v58  ;;  %v1353_v53 = vld [vmem:[#allocation3 + $0x10] sm:$0x33]  ;;  %v1351_v58 = vld [vmem:[#allocation3] sm:$0xee] }
 0x263   :  { %v1373_v11 = vpack.c.b16 %v4695_v0, %v1365_v59  ;;  %v1374_v13 = vpack.c.b16 %v4697_v3, %v1366_v2 }
 0x264   :  { %v4701_v57 = vpack.c.b16 %v1383_v29, %v1383_v29  ;;  %v4703_v14 = vpack.c.b16 %v1384_v6, %v1384_v6 }
 0x265   :  { %2592 = vmatmul.bf16.vlgmr.msra.gmra.mxu1 %v1373_v11  ;;  %2611 = vmatmul.bf16.vlgmr.msra.gmra.mxu2 %v1374_v13  ;;  %v1394_v16 = vshll.u32 %v1373_v11, 16  ;;  %v1406_v21 = vshll.u32 %v1374_v13, 16  ;;  %v1392_v24 = vshrl.u32 %v1373_v11, 16  ;;  %v1404_v26 = vshrl.u32 %v1374_v13, 16  ;;  %v4033_v11 = vld [vmem:[#allocation10 + $0x140] sm:$0xff] }
 0x266   :  { %v1399_v20 = vshll.u32 %v4701_v57, 16  ;;  %v1411_v22 = vshll.u32 %v4703_v14, 16  ;;  %v4025_v13 = vld [vmem:[#allocation10 + $0x100] sm:$0xff]  ;;  %2686 = vmatpush.bf16.msrb.mxu2 %v4033_v11 }
 0x267   :  { %v1396_v25 = vrot.slane %v1394_v16, 1  ;;  %v1408_v32 = vrot.slane %v1406_v21, 1  ;;  %v1342_v16 = vld [vmem:[#allocation3 + $0x2c] sm:$0x3]  ;;  %2667 = vmatpush.bf16.msrb.mxu1 %v4025_v13 }
 0x268   :  { %v4187_v39 = vpop.permute.xlu1 %4186  ;;  %v1401_v61 = vrot.slane %v1399_v20, 1  ;;  %v1413_v35 = vrot.slane %v1411_v22, 1  ;;  %v4042_v20 = vld [vmem:[#allocation10 + $0x188] sm:$0xff] }
 0x269   :  { %v4189_v40 = vunpack.i.h.bf16 %v4187_v39  ;;  %v4188_v41 = vunpack.i.l.bf16 %v4187_v39  ;;  %v1397_v42 = vor.u32 %v1396_v25, %v1392_v24  ;;  %v1409_v62 = vor.u32 %v1408_v32, %v1404_v26  ;;  %v4050_v22 = vld [vmem:[#allocation10 + $0x1c8] sm:$0xff]  ;;  %v4064_v25 = vld [vmem:[#allocation10 + $0x238] sm:$0xff]  ;;  %2704 = vmatpush.bf16.msrb.mxu3 %v4042_v20  ;;  %v4041_v26 = vld [vmem:[#allocation10 + $0x180] sm:$0xff] }
 0x26a   :  { %2755 = vmatpush.bf16.msra.mxu2 %v4072_v37  ;;  %v4071_v32 = vld [vmem:[#allocation10 + $0x270] sm:$0xff]  ;;  %v4070_v39 = vld [vmem:[#allocation10 + $0x268] sm:$0xff]  ;;  %v1446_v20 = vunpack.c.h.b16 %v1351_v58 }
 0x26b   :  { %v1185_v46 = vsel %vm4679_vm0, %v4188_v41, %v4193_v36  ;;  %v1186_v63 = vsel %vm4679_vm0, %v4189_v40, %v4194_v38  ;;  %v1402_v47 = vsel %vm194_vm10, %v1397_v42, %v1401_v61  ;;  %v1414_v49 = vsel %vm194_vm10, %v1409_v62, %v1413_v35  ;;  %2736 = vmatpush.bf16.msra.mxu1 %v4064_v25  ;;  %v4063_v36 = vld [vmem:[#allocation10 + $0x230] sm:$0xff]  ;;  %v4080_v61 = vld [vmem:[#allocation10 + $0x2b8] sm:$0xff]  ;;  %v4062_v40 = vld [vmem:[#allocation10 + $0x228] sm:$0xff] }
 0x26c   :  { %v1189_v50 = vmax.f32 %v4674_v30, %v1185_v46  ;;  %v1190_v51 = vmax.f32 %v4672_v28, %v1186_v63  ;;  %2630 = vmatmul.bf16.vlgmr.msra.gmra.mxu3 %v1402_v47  ;;  %2649 = vmatmul.bf16.vlgmr.msrb.gmra.mxu0 %v1414_v49  ;;  %v4051_v30 = vld [vmem:[#allocation10 + $0x1d0] sm:$0xff]  ;;  %v4088_v35 = vld [vmem:[#allocation10 + $0x2f8] sm:$0xff]  ;;  %v4069_v42 = vld [vmem:[#allocation10 + $0x260] sm:$0xff] }
 0x26d   :  { %2722 = vmatpush.bf16.msra.mxu0 %v4051_v30  ;;  %2705 = vmatpush.bf16.msrb.mxu3 %v4041_v26  ;;  %v1471_v30 = vunpack.c.l.b16 %v1353_v53  ;;  %v4059_v25 = vld [vmem:[#allocation10 + $0x210] sm:$0xff] }
 0x26e   :  { %v1285_v55 = vpack.c.bf16 %v1189_v50, %v1189_v50  ;;  %v1286_v56 = vpack.c.bf16 %v1190_v51, %v1190_v51  ;;  %2756 = vmatpush.bf16.msra.mxu2 %v4071_v32  ;;  %v1450_v32 = vpack.c.b16 %v4697_v3, %v1446_v20  ;;  %v4096_v20 = vld [vmem:[#allocation10 + $0x338] sm:$0xff] }
 0x26f   :  { %2737 = vmatpush.bf16.msra.mxu1 %v4063_v36 }
 0x270   :  { %v1307_v59 = vshrl.u32 %v1285_v55, 16  ;;  %v1310_v2 = vshll.u32 %v1285_v55, 16  ;;  %v1316_v4 = vshrl.u32 %v1286_v56, 16  ;;  %v1319_v29 = vshll.u32 %v1286_v56, 16 }
 0x271   :  { %2723 = vmatpush.bf16.msra.mxu0 %v4050_v22  ;;  %2774 = vmatpush.bf16.msra.mxu3 %v4080_v61  ;;  %v4076_v61 = vld [vmem:[#allocation10 + $0x298] sm:$0xff] }
 0x272   :  { %v1309_v28 = vrot.slane %v1307_v59, 6  ;;  %v1312_v6 = vrot.slane %v1310_v2, 7  ;;  %v1318_v7 = vrot.slane %v1316_v4, 6  ;;  %v1321_v8 = vrot.slane %v1319_v29, 7  ;;  %2757 = vmatpush.bf16.msra.mxu2 %v4070_v39  ;;  %v4068_v59 = vld [vmem:[#allocation10 + $0x258] sm:$0xff]  ;;  %v4078_v2 = vld [vmem:[#allocation10 + $0x2a8] sm:$0xff] }
 0x273   :  { %2738 = vmatpush.bf16.msra.mxu1 %v4062_v40  ;;  %v4066_v39 = vld [vmem:[#allocation10 + $0x248] sm:$0xff] }
 0x274   :  { %v1313_v21 = vor.u32 %v1312_v6, %v1309_v28  ;;  %v1322_v19 = vor.u32 %v1321_v8, %v1318_v7  ;;  %v1472_v28 = vunpack.c.h.b16 %v1353_v53  ;;  %v4086_v6 = vld [vmem:[#allocation10 + $0x2e8] sm:$0xff]  ;;  %v4060_v7 = vld [vmem:[#allocation10 + $0x218] sm:$0xff]  ;;  %v1457_v53 = vrot.slane %v4703_v14, 1 }
 0x275   :  { %2724 = vmatpush.bf16.msra.mxu0 %v4049_v12  ;;  %2775 = vmatpush.bf16.msra.mxu3 %v4079_v27  ;;  %v4058_v40 = vld [vmem:[#allocation10 + $0x208] sm:$0xff] }
 0x276   :  { %v1314_v48 = vrot.slane %v1313_v21, 4  ;;  %v1324_v23 = vrot.slane %v1322_v19, 4  ;;  %v1339_v24 = vsel %vm4580_vm15, %v1313_v21, %v1338_v15  ;;  %2758 = vmatpush.bf16.msra.mxu2 %v4069_v42  ;;  %v4077_v21 = vld [vmem:[#allocation10 + $0x2a0] sm:$0xff]  ;;  %v4739_v12 = vpack.c.b16 %v1472_v28, %v1472_v28 }
 0x277   :  { %1340 = vst [vmem:[#allocation3 + $0x1c] sm:$0xe] %v1339_v24  ;;  %2739 = vmatpush.bf16.msra.mxu1 %v4061_v18  ;;  %v4085_v24 = vld [vmem:[#allocation10 + $0x2e0] sm:$0xff]  ;;  %v1501_v18 = vshll.u32 %v1450_v32, 16 }
 0x278   :  { %v1323_v34 = vsel %vm4595_vm2, %v1314_v48, %v1322_v19  ;;  %v1343_v38 = vsel %vm4495_vm14, %v1324_v23, %v1342_v16  ;;  %v4067_v16 = vld [vmem:[#allocation10 + $0x250] sm:$0xff]  ;;  %v1445_v19 = vunpack.c.l.b16 %v1351_v58  ;;  %vm4957_vm14 = vsmask.f32 5376 }
 0x279   :  { %1341 = vst [vmem:[#allocation3 + $0x24] sm:$0xf] %v1323_v34  ;;  %2793 = vmatpush.bf16.msrb.mxu0 %v4088_v35  ;;  %2776 = vmatpush.bf16.msra.mxu3 %v4078_v2  ;;  %v4735_v34 = vpack.c.b16 %v1471_v30, %v1471_v30  ;;  %v4084_v35 = vld [vmem:[#allocation10 + $0x2d8] sm:$0xff]  ;;  %v4083_v2 = vld [vmem:[#allocation10 + $0x2d0] sm:$0xff]  ;;  %v1503_v30 = vrot.slane %v1501_v18, 2  ;;  %vm4958_vm1 = vmmov %vm4957_vm14 }
 0x27a   :  { %1344 = vst [vmem:[#allocation3 + $0x2c] sm:$0x3] %v1343_v38  ;;  %2759 = vmatpush.bf16.msra.mxu2 %v4068_v59  ;;  %v1449_v26 = vpack.c.b16 %v4695_v0, %v1445_v19  ;;  %v4082_v19 = vld [vmem:[#allocation10 + $0x2c8] sm:$0xff]  ;;  %vm4959_vm3 = vmmov %vm4958_vm1 }
 0x27b   :  { %2740 = vmatpush.bf16.msra.mxu1 %v4060_v7  ;;  %v1492_v42 = vshll.u32 %v4735_v34, 16  ;;  %vm4960_vm4 = vmmov %vm4958_vm1 }
 0x27c   :  { %v1484_v27 = vshll.u32 %v1449_v26, 16 }
 0x27d   :  { %2794 = vmatpush.bf16.msrb.mxu0 %v4087_v10  ;;  %2777 = vmatpush.bf16.msra.mxu3 %v4077_v21  ;;  %v1489_v10 = vshrl.u32 %v4735_v34, 16  ;;  %v1494_v59 = vrot.slane %v1492_v42, 2 }
 0x27e   :  { %v1347_v41 = vld [vmem:[#allocation3 + $0x18] sm:$0xff]  ;;  %2760 = vmatpush.bf16.msra.mxu2 %v4067_v16 }
 0x27f   :  { %v1369_v43 = vunpack.c.l.b16 %v1347_v41  ;;  %v1370_v46 = vunpack.c.h.b16 %v1347_v41  ;;  %2741 = vmatpush.bf16.msra.mxu1 %v4059_v25  ;;  %v1481_v41 = vshrl.u32 %v1449_v26, 16  ;;  %v1491_v58 = vrot.slane %v1489_v10, 1  ;;  %v1352_v14 = vld [vmem:[#allocation3 + $0x18] sm:$0xee] }
 0x280   :  { %v1348_v62 = vld [vmem:[#allocation3 + $0x20] sm:$0xff]  ;;  %v1447_v25 = vunpack.c.l.b16 %v1352_v14  ;;  %v4094_v10 = vld [vmem:[#allocation10 + $0x328] sm:$0xff] }
 0x281   :  { %v4721_v45 = vunpack.c.l.b16 %v1348_v62  ;;  %v4723_v63 = vunpack.c.h.b16 %v1348_v62  ;;  %v1350_v47 = vld [vmem:[#allocation3 + $0x28] sm:$0x11]  ;;  %2795 = vmatpush.bf16.msrb.mxu0 %v4086_v6  ;;  %v1498_v62 = vshrl.u32 %v1450_v32, 16  ;;  %2778 = vmatpush.bf16.msra.mxu3 %v4076_v61  ;;  %v1495_v16 = vor.u32 %v1494_v59, %v1491_v58  ;;  %v4081_v61 = vld [vmem:[#allocation10 + $0x2c0] sm:$0xff] }
 0x282   :  { %v1385_v49 = vunpack.c.l.b16 %v1350_v47  ;;  %v1386_v50 = vunpack.c.h.b16 %v1350_v47  ;;  %2761 = vmatpush.bf16.msra.mxu2 %v4066_v39  ;;  %v4065_v47 = vld [vmem:[#allocation10 + $0x240] sm:$0xff]  ;;  %v1354_v7 = vld [vmem:[#allocation3 + $0x28] sm:$0x33] }
 0x283   :  { %v1375_v51 = vpack.c.b16 %v4721_v45, %v1369_v43  ;;  %v1376_v52 = vpack.c.b16 %v4723_v63, %v1370_v46  ;;  %v1506_v43 = vshrl.u32 %v4739_v12, 16  ;;  %v1509_v46 = vshll.u32 %v4739_v12, 16  ;;  %2742 = vmatpush.bf16.msra.mxu1 %v4058_v40 }
 0x284   :  { %v4727_v55 = vpack.c.b16 %v1385_v49, %v1385_v49  ;;  %v4729_v56 = vpack.c.b16 %v1386_v50, %v1386_v50  ;;  %v4075_v49 = vld [vmem:[#allocation10 + $0x290] sm:$0xff]  ;;  %v1453_v50 = vrot.slane %v1449_v26, 1  ;;  %v1473_v21 = vunpack.c.l.b16 %v1354_v7 }
 0x285   :  { %2597 = vmatmul.bf16.gmra.mxu1 %v1375_v51  ;;  %2616 = vmatmul.bf16.gmra.mxu2 %v1376_v52  ;;  %v1418_v9 = vshll.u32 %v1375_v51, 16  ;;  %v1430_v44 = vshll.u32 %v1376_v52, 16  ;;  %v1416_v8 = vshrl.u32 %v1375_v51, 16  ;;  %v1428_v13 = vshrl.u32 %v1376_v52, 16 }
 0x286   :  { %v1423_v4 = vshll.u32 %v4727_v55, 16  ;;  %v1435_v29 = vshll.u32 %v4729_v56, 16  ;;  %2796 = vmatpush.bf16.msrb.mxu0 %v4085_v24  ;;  %v1454_v51 = vrot.slane %v4701_v57, 1  ;;  %v1456_v52 = vrot.slane %v1450_v32, 1  ;;  %2762 = vmatpush.bf16.msra.mxu2 %v4065_v47  ;;  %v4103_v24 = vld [vmem:[#allocation10 + $0x370] sm:$0xff] }
 0x287   :  { %v1420_v11 = vrot.slane %v1418_v9, 1  ;;  %v1432_v15 = vrot.slane %v1430_v44, 1  ;;  %v1483_v9 = vrot.slane %v1481_v41, 1  ;;  %v1486_v44 = vrot.slane %v1484_v27, 2  ;;  %2779 = vmatpush.bf16.msra.mxu3 %v4075_v49  ;;  %v4095_v32 = vld [vmem:[#allocation10 + $0x330] sm:$0xff]  ;;  %v4102_v27 = vld [vmem:[#allocation10 + $0x368] sm:$0xff] }
 0x288   :  { %v1425_v37 = vrot.slane %v1423_v4, 1  ;;  %v1437_v23 = vrot.slane %v1435_v29, 1  ;;  %v4057_v4 = vld [vmem:[#allocation10 + $0x200] sm:$0xff]  ;;  %v1500_v29 = vrot.slane %v1498_v62, 1  ;;  %v1508_v28 = vrot.slane %v1506_v43, 1 }
 0x289   :  { %v1421_v22 = vor.u32 %v1420_v11, %v1416_v8  ;;  %v1433_v48 = vor.u32 %v1432_v15, %v1428_v13  ;;  %v1511_v6 = vrot.slane %v1509_v46, 2  ;;  %v1455_v57 = vsel %vm227_vm9, %v1453_v50, %v1454_v51  ;;  %v4074_v11 = vld [vmem:[#allocation10 + $0x288] sm:$0xff]  ;;  %v4104_v13 = vld [vmem:[#allocation10 + $0x378] sm:$0xff]  ;;  %2743 = vmatpush.bf16.msra.mxu1 %v4057_v4  ;;  %v4101_v51 = vld [vmem:[#allocation10 + $0x360] sm:$0xff] }
 0x28a   :  { %2797 = vmatpush.bf16.msrb.mxu0 %v4084_v35  ;;  %v1458_v8 = vsel %vm227_vm9, %v1456_v52, %v1457_v53  ;;  %v1487_v15 = vor.u32 %v1486_v44, %v1483_v9  ;;  %v1448_v26 = vunpack.c.h.b16 %v1352_v14  ;;  %v4751_v39 = vpack.c.b16 %v1473_v21, %v1473_v21 }
 0x28b   :  { %v1426_v38 = vsel %vm194_vm10, %v1421_v22, %v1425_v37  ;;  %v1438_v36 = vsel %vm194_vm10, %v1433_v48, %v1437_v23  ;;  %vm1479_vm10 = vsmask.f32 6400  ;;  %v1504_v22 = vor.u32 %v1503_v30, %v1500_v29  ;;  %2780 = vmatpush.bf16.msra.mxu3 %v4074_v11  ;;  %v4073_v23 = vld [vmem:[#allocation10 + $0x280] sm:$0xff] }
 0x28c   :  { %2635 = vmatmul.bf16.gmra.mxu3 %v1426_v38  ;;  %2654 = vmatmul.bf16.gmra.mxu0 %v1438_v36  ;;  %v1512_v37 = vor.u32 %v1511_v6, %v1508_v28  ;;  %v1474_v48 = vunpack.c.h.b16 %v1354_v7  ;;  %v1496_v38 = vsel %vm1479_vm10, %v1487_v15, %v1495_v16  ;;  %v1451_v36 = vpack.c.b16 %v4721_v45, %v1447_v25  ;;  %v4093_v29 = vld [vmem:[#allocation10 + $0x320] sm:$0xff]  ;;  %v4092_v15 = vld [vmem:[#allocation10 + $0x318] sm:$0xff]  ;;  %v4091_v25 = vld [vmem:[#allocation10 + $0x310] sm:$0xff] }
 0x28d   :  { %v1452_v40 = vpack.c.b16 %v4723_v63, %v1448_v26  ;;  %v1523_v18 = vshrl.u32 %v4751_v39, 16  ;;  %v1526_v43 = vshll.u32 %v4751_v39, 16  ;;  %v1460_v53 = vrot.slane %v4727_v55, 1  ;;  %v1355_v55 = vld [vmem:[#allocation3] sm:$0xcc] }
 0x28e   :  { %2798 = vmatpush.bf16.msrb.mxu0 %v4083_v2  ;;  %v1513_v35 = vsel %vm1479_vm10, %v1504_v22, %v1512_v37  ;;  %v4755_v41 = vpack.c.b16 %v1474_v48, %v1474_v48  ;;  %v1515_v42 = vshrl.u32 %v1451_v36, 16  ;;  %v1518_v62 = vshll.u32 %v1451_v36, 16  ;;  %v4099_v22 = vld [vmem:[#allocation10 + $0x350] sm:$0xff] }
 0x28f   :  { %2781 = vmatpush.bf16.msra.mxu3 %v4073_v23  ;;  %v1532_v46 = vshrl.u32 %v1452_v40, 16  ;;  %v1535_v47 = vshll.u32 %v1452_v40, 16  ;;  %v1459_v52 = vrot.slane %v1451_v36, 1  ;;  %v1462_v9 = vrot.slane %v1452_v40, 1 }
 0x290   :  { %v1540_v49 = vshrl.u32 %v4755_v41, 16  ;;  %v1543_v50 = vshll.u32 %v4755_v41, 16  ;;  %v1463_v44 = vrot.slane %v4729_v56, 1  ;;  %v1517_v58 = vrot.slane %v1515_v42, 1  ;;  %v4100_v56 = vld [vmem:[#allocation10 + $0x358] sm:$0xff]  ;;  %v4090_v42 = vld [vmem:[#allocation10 + $0x308] sm:$0xff] }
 0x291   :  { %v1520_v59 = vrot.slane %v1518_v62, 2  ;;  %v1525_v2 = vrot.slane %v1523_v18, 1  ;;  %v1528_v4 = vrot.slane %v1526_v43, 2  ;;  %v1534_v30 = vrot.slane %v1532_v46, 1 }
 0x292   :  { %2799 = vmatpush.bf16.msrb.mxu0 %v4082_v19  ;;  %v1537_v28 = vrot.slane %v1535_v47, 2  ;;  %v1542_v6 = vrot.slane %v1540_v49, 1  ;;  %v1545_v7 = vrot.slane %v1543_v50, 2  ;;  %v1464_v14 = vsel %vm227_vm9, %v1462_v9, %v1463_v44  ;;  %v4097_v47 = vld [vmem:[#allocation10 + $0x340] sm:$0xff] }
 0x293   :  { %v1521_v16 = vor.u32 %v1520_v59, %v1517_v58  ;;  %v1529_v21 = vor.u32 %v1528_v4, %v1525_v2  ;;  %v1554_v37 = vunpack.c.l.b16 %v1355_v55  ;;  %v1555_v48 = vunpack.c.h.b16 %v1355_v55  ;;  %v4089_v59 = vld [vmem:[#allocation10 + $0x300] sm:$0xff] }
 0x294   :  { %v1538_v19 = vor.u32 %v1537_v28, %v1534_v30  ;;  %v1564_v50 = vrot.slane %v4735_v34, 2  ;;  %v1358_v28 = vld [vmem:[#allocation3 + $0x28] sm:$0x77] }
 0x295   :  { %2668 = vmatmul.bf16.vlgmr.msrb.gmra.mxu1 %v1455_v57  ;;  %2687 = vmatmul.bf16.vlgmr.msrb.gmra.mxu2 %v1458_v8  ;;  %v1357_v57 = vld [vmem:[#allocation3 + $0x10] sm:$0x77]  ;;  %v1461_v8 = vsel %vm227_vm9, %v1459_v52, %v1460_v53  ;;  %v1558_v23 = vpack.c.b16 %v4695_v0, %v1554_v37  ;;  %v1530_v26 = vsel %vm1479_vm10, %v1521_v16, %v1529_v21  ;;  %v1567_v52 = vrot.slane %v4739_v12, 2  ;;  %v1356_v12 = vld [vmem:[#allocation3 + $0x18] sm:$0xcc] }
 0x296   :  { %2831 = vmatpush.bf16.msrb.mxu2 %v4104_v13  ;;  %2812 = vmatpush.bf16.msrb.mxu1 %v4096_v20  ;;  %v1581_v11 = vunpack.c.l.b16 %v1357_v57  ;;  %v1582_v13 = vunpack.c.h.b16 %v1357_v57  ;;  %v1546_v20 = vor.u32 %v1545_v7, %v1542_v6  ;;  %vm1562_vm9 = vcmask 1045504  }
 0x297   :  { %2800 = vmatpush.bf16.msrb.mxu0 %v4081_v61  ;;  %v4098_v61 = vld [vmem:[#allocation10 + $0x348] sm:$0xff]  ;;  %v1593_v40 = vshll.u32 %v1558_v23, 16  ;;  %v1563_v49 = vrot.slane %v1558_v23, 2  ;;  %v1583_v57 = vunpack.c.l.b16 %v1358_v28 }
 0x298   :  { %v4771_v36 = vpack.c.b16 %v1582_v13, %v1582_v13  ;;  %v1557_v13 = vunpack.c.h.b16 %v1356_v12 }
 0x299   :  { %v1595_v9 = vrot.slane %v1593_v40, 3  ;;  %v1565_v6 = vsel %vm1562_vm9, %v1563_v49, %v1564_v50  ;;  %v4782_v16 = vpack.c.b16 %v1583_v57, %v1583_v57  ;;  %v1570_v40 = vrot.slane %v4751_v39, 2 }
 0x29a   :  { %2832 = vmatpush.bf16.msrb.mxu2 %v4103_v24  ;;  %2813 = vmatpush.bf16.msrb.mxu1 %v4095_v32  ;;  %v4766_v24 = vpack.c.b16 %v1581_v11, %v1581_v11  ;;  %v1547_v32 = vsel %vm1479_vm10, %v1538_v19, %v1546_v20  ;;  %v1615_v43 = vshrl.u32 %v4771_v36, 16  ;;  %v1618_v46 = vshll.u32 %v4771_v36, 16 }
 0x29b   :  { %v1556_v11 = vunpack.c.l.b16 %v1356_v12  ;;  %v1561_v20 = vpack.c.b16 %v4723_v63, %v1557_v13  ;;  %v1676_v12 = vrot.slane %v4771_v36, 3 }
 0x29c   :  { %2706 = vmatmul.bf16.vlgmr.msrb.gmra.mxu3 %v1496_v38  ;;  %2725 = vmatmul.bf16.vlgmr.msra.gmra.mxu0 %v1513_v35  ;;  %v1559_v38 = vpack.c.b16 %v4697_v3, %v1555_v48  ;;  %v1590_v35 = vshrl.u32 %v1558_v23, 16  ;;  %v1620_v30 = vrot.slane %v1618_v46, 3  ;;  %v1632_v23 = vshrl.u32 %v4782_v16, 16 }
 0x29e   :  { %2833 = vmatpush.bf16.msrb.mxu2 %v4102_v27  ;;  %2814 = vmatpush.bf16.msrb.mxu1 %v4094_v10  ;;  %v1598_v27 = vshrl.u32 %v4766_v24, 16  ;;  %v1601_v10 = vshll.u32 %v4766_v24, 16  ;;  %v1607_v62 = vshrl.u32 %v1559_v38, 16  ;;  %v1610_v18 = vshll.u32 %v1559_v38, 16 }
 0x29f   :  { %v1592_v53 = vrot.slane %v1590_v35, 2 }
 0x2a0   :  { %v1600_v44 = vrot.slane %v1598_v27, 2  ;;  %v1603_v58 = vrot.slane %v1601_v10, 3  ;;  %v1609_v2 = vrot.slane %v1607_v62, 2  ;;  %v1612_v4 = vrot.slane %v1610_v18, 3 }
 0x2a1   :  { %v1596_v7 = vor.u32 %v1595_v9, %v1592_v53  ;;  %v1572_v27 = vrot.slane %v1561_v20, 2  ;;  %v1573_v10 = vrot.slane %v4755_v41, 2  ;;  %v1634_v18 = vrot.slane %v1632_v23, 2 }
 0x2a2   :  { %2834 = vmatpush.bf16.msrb.mxu2 %v4101_v51  ;;  %2815 = vmatpush.bf16.msrb.mxu1 %v4093_v29  ;;  %v1566_v51 = vrot.slane %v1559_v38, 2  ;;  %v1617_v29 = vrot.slane %v1615_v43, 2 }
 0x2a4   :  { %v1568_v34 = vsel %vm1562_vm9, %v1566_v51, %v1567_v52  ;;  %v1621_v55 = vor.u32 %v1620_v30, %v1617_v29  ;;  %v1574_v52 = vsel %vm1562_vm9, %v1572_v27, %v1573_v10 }
 0x2a5   :  { %2673 = vmatmul.bf16.gmra.mxu1 %v1461_v8  ;;  %2692 = vmatmul.bf16.gmra.mxu2 %v1464_v14  ;;  %v1604_v8 = vor.u32 %v1603_v58, %v1600_v44  ;;  %v1613_v14 = vor.u32 %v1612_v4, %v1609_v2  ;;  %v1359_v58 = vld [vmem:[#allocation3] sm:$0x88] }
 0x2a6   :  { %2835 = vmatpush.bf16.msrb.mxu2 %v4100_v56  ;;  %2816 = vmatpush.bf16.msrb.mxu1 %v4092_v15  ;;  %v1584_v56 = vunpack.c.h.b16 %v1358_v28  ;;  %v1560_v15 = vpack.c.b16 %v4721_v45, %v1556_v11  ;;  %v1663_v41 = vunpack.c.l.b16 %v1359_v58  ;;  %v1679_v11 = vrot.slane %v4782_v16, 3 }
 0x2a7   :  { %v1605_v21 = vsel %vm4957_vm14, %v1596_v7, %v1604_v8  ;;  %v1622_v19 = vsel %vm4958_vm1, %v1613_v14, %v1621_v55  ;;  %v1360_v8 = vld [vmem:[#allocation3 + $0x18] sm:$0x88] }
 0x2a8   :  { %v1624_v37 = vshrl.u32 %v1560_v15, 16  ;;  %v1627_v48 = vshll.u32 %v1560_v15, 16  ;;  %v1569_v35 = vrot.slane %v1560_v15, 2  ;;  %v1667_v29 = vpack.c.b16 %v4695_v0, %v1663_v41 }
 0x2a9   :  { %v1665_v14 = vunpack.c.l.b16 %v1360_v8  ;;  %v1666_v55 = vunpack.c.h.b16 %v1360_v8 }
 0x2aa   :  { %2836 = vmatpush.bf16.msrb.mxu2 %v4099_v22  ;;  %2817 = vmatpush.bf16.msrb.mxu1 %v4091_v25  ;;  %v1588_v22 = vpack.c.b16 %v1584_v56, %v1584_v56  ;;  %v1635_v25 = vshll.u32 %v4782_v16, 16  ;;  %v1629_v62 = vrot.slane %v1627_v48, 3  ;;  %v1571_v51 = vsel %vm1562_vm9, %v1569_v35, %v1570_v40  ;;  %v4803_v56 = vpop.f32.mrf.mxu2 }
 0x2ab   :  { %v1672_v28 = vrot.slane %v1667_v29, 3  ;;  %v1669_v0 = vpack.c.b16 %v4721_v45, %v1665_v14 }
 0x2ac   :  { %2711 = vmatmul.bf16.gmra.mxu3 %v1530_v26  ;;  %2730 = vmatmul.bf16.gmra.mxu0 %v1547_v32  ;;  %v1641_v26 = vshrl.u32 %v1561_v20, 16  ;;  %v1644_v32 = vshll.u32 %v1561_v20, 16  ;;  %v1649_v38 = vshrl.u32 %v1588_v22, 16  ;;  %v1637_v43 = vrot.slane %v1635_v25, 3  ;;  %v4808_v20 = vpop.f32.mrf.mxu0 }
 0x2ad   :  { %v1682_v13 = vrot.slane %v1588_v22, 3 }
 0x2ae   :  { %2837 = vmatpush.bf16.msrb.mxu2 %v4098_v61  ;;  %2818 = vmatpush.bf16.msrb.mxu1 %v4090_v42  ;;  %v1652_v61 = vshll.u32 %v1588_v22, 16  ;;  %v1626_v42 = vrot.slane %v1624_v37, 2  ;;  %v1643_v46 = vrot.slane %v1641_v26, 2  ;;  %v1651_v49 = vrot.slane %v1649_v38, 2  ;;  %v4810_v37 = vpop.f32.mrf.mxu3 }
 0x2af   :  { %v1638_v9 = vor.u32 %v1637_v43, %v1634_v18 }
 0x2b0   :  { %v1654_v50 = vrot.slane %v1652_v61, 3  ;;  %v1630_v53 = vor.u32 %v1629_v62, %v1626_v42 }
 0x2b2   :  { %2838 = vmatpush.bf16.msrb.mxu2 %v4097_v47  ;;  %2819 = vmatpush.bf16.msrb.mxu1 %v4089_v59  ;;  %v1646_v47 = vrot.slane %v1644_v32, 3  ;;  %v1655_v44 = vor.u32 %v1654_v50, %v1651_v49  ;;  %v1664_v59 = vunpack.c.h.b16 %v1359_v58  ;;  %v1639_v2 = vsel %vm4959_vm3, %v1630_v53, %v1638_v9 }
 0x2b4   :  { %v1647_v39 = vor.u32 %v1646_v47, %v1643_v46  ;;  %v1668_v30 = vpack.c.b16 %v4697_v3, %v1664_v59  ;;  %v1670_v3 = vpack.c.b16 %v4723_v63, %v1666_v55 }
 0x2b5   :  { %2744 = vmatmul.bf16.vlgmr.msra.gmra.mxu1 %v1565_v6  ;;  %2763 = vmatmul.bf16.vlgmr.msra.gmra.mxu2 %v1568_v34  ;;  %v1673_v6 = vrot.slane %v4766_v24, 3  ;;  %v1678_v24 = vrot.slane %v1669_v0, 3 }
 0x2b6   :  { %v1656_v4 = vsel %vm4960_vm4, %v1647_v39, %v1655_v44  ;;  %v1675_v34 = vrot.slane %v1668_v30, 3  ;;  %v1681_v36 = vrot.slane %v1670_v3, 3 }
 0x2b7   :  { %v1674_v7 = vsel %vm1671_vm5, %v1672_v28, %v1673_v6  ;;  %v1680_v15 = vsel %vm1671_vm5, %v1678_v24, %v1679_v11 }
 0x2b8   :  { %v1677_v57 = vsel %vm1671_vm5, %v1675_v34, %v1676_v12 }
 0x2bc   :  { %2782 = vmatmul.bf16.vlgmr.msra.gmra.mxu3 %v1605_v21  ;;  %2801 = vmatmul.bf16.vlgmr.msrb.gmra.mxu0 %v1622_v19  ;;  %v1683_v21 = vsel %vm1671_vm5, %v1681_v36, %v1682_v13 }
 0x2c5   :  { %2749 = vmatmul.bf16.gmra.mxu1 %v1571_v51  ;;  %2768 = vmatmul.bf16.gmra.mxu2 %v1574_v52 }
 0x2cc   :  { %2787 = vmatmul.bf16.gmra.mxu3 %v1639_v2  ;;  %2806 = vmatmul.bf16.gmra.mxu0 %v1656_v4 }
 0x2d5   :  { %2820 = vmatmul.bf16.vlgmr.msrb.gmra.mxu1 %v1674_v7  ;;  %2839 = vmatmul.bf16.vlgmr.msrb.gmra.mxu2 %v1677_v57 }
 0x2e2   :  { %v2593_v19 = vpop.f32.mrf.mxu1 }
 0x2e5   :  { %2825 = vmatmul.bf16.gmra.mxu1 %v1680_v15  ;;  %2844 = vmatmul.bf16.gmra.mxu2 %v1683_v21 }
 0x2e8   :  { %v2612_v45 = vpop.f32.mrf.mxu2 }
 0x2e9   :  { %v2613_v63 = vadd.f32 %v2612_v45, %v2593_v19  ;;  %v2650_v48 = vpop.f32.mrf.mxu0 }
 0x2ea   :  { %v2595_v25 = vpop.f32.mrf.mxu1 }
 0x2ef   :  { %v2631_v23 = vpop.f32.mrf.mxu3 }
 0x2f0   :  { %v2632_v26 = vadd.f32 %v2631_v23, %v2613_v63  ;;  %v2614_v16 = vpop.f32.mrf.mxu2 }
 0x2f1   :  { %v2615_v32 = vadd.f32 %v2614_v16, %v2595_v25  ;;  %v2652_v35 = vpop.f32.mrf.mxu0 }
 0x2f2   :  { %v2651_v22 = vadd.f32 %v2650_v48, %v2632_v26 }
 0x2f7   :  { %v2633_v38 = vpop.f32.mrf.mxu3 }
 0x2f8   :  { %v2634_v61 = vadd.f32 %v2633_v38, %v2615_v32 }
 0x2fa   :  { %v2653_v40 = vadd.f32 %v2652_v35, %v2634_v61 }
 0x302   :  { %v2598_v27 = vpop.f32.mrf.mxu1 }
 0x308   :  { %v2617_v10 = vpop.f32.mrf.mxu2 }
 0x309   :  { %v2618_v42 = vadd.f32 %v2617_v10, %v2598_v27  ;;  %v2655_v47 = vpop.f32.mrf.mxu0 }
 0x30a   :  { %v2600_v62 = vpop.f32.mrf.mxu1 }
 0x30f   :  { %v2636_v18 = vpop.f32.mrf.mxu3 }
 0x310   :  { %v2619_v43 = vpop.f32.mrf.mxu2  ;;  %v2637_v19 = vadd.f32 %v2636_v18, %v2618_v42 }
 0x311   :  { %v2620_v46 = vadd.f32 %v2619_v43, %v2600_v62  ;;  %v2657_v44 = vpop.f32.mrf.mxu0 }
 0x312   :  { %v2669_v49 = vpop.f32.mrf.mxu1  ;;  %v2656_v26 = vadd.f32 %v2655_v47, %v2637_v19 }
 0x313   :  { %v2670_v50 = vadd.f32 %v2669_v49, %v2651_v22 }
 0x317   :  { %v2638_v51 = vpop.f32.mrf.mxu3 }
 0x318   :  { %v2688_v52 = vpop.f32.mrf.mxu2  ;;  %v2639_v35 = vadd.f32 %v2638_v51, %v2620_v46 }
 0x319   :  { %v2689_v53 = vadd.f32 %v2688_v52, %v2670_v50  ;;  %v2726_v4 = vpop.f32.mrf.mxu0 }
 0x31a   :  { %v2671_v9 = vpop.f32.mrf.mxu1  ;;  %v2658_v18 = vadd.f32 %v2657_v44, %v2639_v35  ;;  %v4111_v35 = vld [vmem:[%s4924_s6 + $0x30] sm:$0xff] }
 0x31b   :  { %v2672_v39 = vadd.f32 %v2671_v9, %v2653_v40 }
 0x31f   :  { %v2707_v58 = vpop.f32.mrf.mxu3 }
 0x320   :  { %v2690_v41 = vpop.f32.mrf.mxu2  ;;  %v2708_v11 = vadd.f32 %v2707_v58, %v2689_v53 }
 0x321   :  { %v2691_v59 = vadd.f32 %v2690_v41, %v2672_v39  ;;  %v2728_v6 = vpop.f32.mrf.mxu0 }
 0x322   :  { %v2674_v2 = vpop.f32.mrf.mxu1  ;;  %v2727_v21 = vadd.f32 %v2726_v4, %v2708_v11 }
 0x323   :  { %v2675_v38 = vadd.f32 %v2674_v2, %v2656_v26 }
 0x327   :  { %v2709_v30 = vpop.f32.mrf.mxu3 }
 0x328   :  { %v2693_v29 = vpop.f32.mrf.mxu2  ;;  %v2710_v48 = vadd.f32 %v2709_v30, %v2691_v59 }
 0x329   :  { %v2731_v8 = vpop.f32.mrf.mxu0  ;;  %v2694_v40 = vadd.f32 %v2693_v29, %v2675_v38 }
 0x32a   :  { %v2676_v28 = vpop.f32.mrf.mxu1  ;;  %v2729_v61 = vadd.f32 %v2728_v6, %v2710_v48 }
 0x32b   :  { %v2677_v39 = vadd.f32 %v2676_v28, %v2658_v18  ;;  %v4110_v18 = vld [vmem:[%s4924_s6 + $0x28] sm:$0xff] }
 0x32f   :  { %v2712_v7 = vpop.f32.mrf.mxu3 }
 0x330   :  { %v2695_v34 = vpop.f32.mrf.mxu2  ;;  %v2713_v62 = vadd.f32 %v2712_v7, %v2694_v40 }
 0x331   :  { %v2733_v24 = vpop.f32.mrf.mxu0  ;;  %v2696_v59 = vadd.f32 %v2695_v34, %v2677_v39 }
 0x332   :  { %v2745_v12 = vpop.f32.mrf.mxu1  ;;  %v2732_v47 = vadd.f32 %v2731_v8, %v2713_v62 }
 0x333   :  { %v2746_v45 = vadd.f32 %v2745_v12, %v2727_v21 }
 0x337   :  { %v2714_v55 = vpop.f32.mrf.mxu3 }
 0x338   :  { %v2764_v57 = vpop.f32.mrf.mxu2  ;;  %v2715_v51 = vadd.f32 %v2714_v55, %v2696_v59 }
 0x339   :  { %v2802_v63 = vpop.f32.mrf.mxu0  ;;  %v2765_v23 = vadd.f32 %v2764_v57, %v2746_v45 }
 0x33a   :  { %v2747_v14 = vpop.f32.mrf.mxu1 }
 0x33b   :  { %v2748_v27 = vadd.f32 %v2747_v14, %v2729_v61  ;;  %v2734_v14 = vadd.f32 %v2733_v24, %v2715_v51 }
 0x33f   :  { %v2783_v36 = vpop.f32.mrf.mxu3 }
 0x340   :  { %v2766_v0 = vpop.f32.mrf.mxu2  ;;  %v2784_v16 = vadd.f32 %v2783_v36, %v2765_v23 }
 0x341   :  { %v2767_v43 = vadd.f32 %v2766_v0, %v2748_v27  ;;  %v2804_v50 = vpop.f32.mrf.mxu0 }
 0x342   :  { %v2750_v3 = vpop.f32.mrf.mxu1  ;;  %v2803_v10 = vadd.f32 %v2802_v63, %v2784_v16 }
 0x343   :  { %v2751_v2 = vadd.f32 %v2750_v3, %v2732_v47 }
 0x347   :  { %v2785_v32 = vpop.f32.mrf.mxu3 }
 0x348   :  { %v2769_v13 = vpop.f32.mrf.mxu2  ;;  %v2786_v52 = vadd.f32 %v2785_v32, %v2767_v43 }
 0x349   :  { %v2770_v4 = vadd.f32 %v2769_v13, %v2751_v2  ;;  %v2807_v7 = vpop.f32.mrf.mxu0 }
 0x34a   :  { %v2752_v15 = vpop.f32.mrf.mxu1  ;;  %v2805_v46 = vadd.f32 %v2804_v50, %v2786_v52 }
 0x34b   :  { %v2753_v28 = vadd.f32 %v2752_v15, %v2734_v14 }
 0x34f   :  { %v2788_v41 = vpop.f32.mrf.mxu3 }
 0x350   :  { %v2771_v25 = vpop.f32.mrf.mxu2  ;;  %v2789_v6 = vadd.f32 %v2788_v41, %v2770_v4  ;;  %v4109_v41 = vld [vmem:[%s4924_s6 + $0x20] sm:$0xff] }
 0x351   :  { %v2772_v34 = vadd.f32 %v2771_v25, %v2753_v28  ;;  %v2809_v48 = vpop.f32.mrf.mxu0  ;;  %v4112_v25 = vld [vmem:[%s4924_s6 + $0x38] sm:$0xff] }
 0x352   :  { %v2821_v22 = vpop.f32.mrf.mxu1  ;;  %v2808_v8 = vadd.f32 %v2807_v7, %v2789_v6  ;;  %3035 = vmatpush.bf16.msrb.mxu3 %v4112_v25  ;;  %v4108_v7 = vld [vmem:[%s4924_s6 + $0x18] sm:$0xff] }
 0x353   :  { %v2822_v49 = vadd.f32 %v2821_v22, %v2803_v10 }
 0x356   :  { %3036 = vmatpush.bf16.msrb.mxu3 %v4111_v35 }
 0x357   :  { %v2790_v36 = vpop.f32.mrf.mxu3 }
 0x358   :  { %v2840_v42 = vpop.f32.mrf.mxu2  ;;  %v2791_v55 = vadd.f32 %v2790_v36, %v2772_v34 }
 0x359   :  { %v2841_v53 = vadd.f32 %v2840_v42, %v2822_v49 }
 0x35a   :  { %v2823_v9 = vpop.f32.mrf.mxu1  ;;  %v2810_v24 = vadd.f32 %v2809_v48, %v2791_v55  ;;  %3037 = vmatpush.bf16.msrb.mxu3 %v4110_v18  ;;  %v4106_v48 = vld [vmem:[%s4924_s6 + $0x8] sm:$0xff]  ;;  %v4224_v18 = vld [vmem:[%s4918_s0 + $0x10] sm:$0xff] }
 0x35b   :  { %v3884_v58 = vmul.f32 -1.442695, %v2841_v53  ;;  %v2824_v29 = vadd.f32 %v2823_v9, %v2805_v46 }
 0x35d   :  { %4197 = vpow2.f32 %v3884_v58 }
 0x35e   :  { %3038 = vmatpush.bf16.msrb.mxu3 %v4109_v41 }
 0x360   :  { %v2842_v30 = vpop.f32.mrf.mxu2 }
 0x361   :  { %v2843_v12 = vadd.f32 %v2842_v30, %v2824_v29 }
 0x362   :  { %v2826_v57 = vpop.f32.mrf.mxu1  ;;  %3039 = vmatpush.bf16.msrb.mxu3 %v4108_v7 }
 0x363   :  { %v4198_v44 = vpop.eup %4197  ;;  %v3885_v0 = vmul.f32 -1.442695, %v2843_v12  ;;  %v2827_v3 = vadd.f32 %v2826_v57, %v2808_v8  ;;  %v4221_v57 = vld [vmem:[%s4918_s0] sm:$0xff] }
 0x364   :  { %v2862_v11 = vadd.f32 1.0, %v4198_v44  ;;  %v4838_v44 = vadd.f32 %v4221_v57, %v4641_v17  ;;  %v4107_v17 = vld [vmem:[%s4924_s6 + $0x10] sm:$0xff] }
 0x365   :  { %4199 = vpow2.f32 %v3885_v0 }
 0x366   :  { %4201 = vrcp.f32 %v2862_v11  ;;  %v2877_v43 = vand.u32 2147483648, %v2862_v11  ;;  %vm2871_vm13 = vweird.f32 %v2862_v11  ;;  %v2875_v50 = vand.u32 2147483647, %v2862_v11  ;;  %3040 = vmatpush.bf16.msrb.mxu3 %v4107_v17 }
 0x368   :  { %v2845_v21 = vpop.f32.mrf.mxu2  ;;  %v2878_v9 = vor.u32 1.1754944e-38, %v2877_v43  ;;  %vm2876_vm8 = vcmp.eq.f32.partialorder %v2875_v50, 8.507059e+37 }
 0x369   :  { %v2846_v13 = vadd.f32 %v2845_v21, %v2827_v3  ;;  %v4346_v3 = vmov 16.0  }
 0x36a   :  { %v2828_v26 = vpop.f32.mrf.mxu1  ;;  %3041 = vmatpush.bf16.msrb.mxu3 %v4106_v48  ;;  %v3084_v48 = vld [vmem:[%s4926_s8] sm:$0xf] }
 0x36b   :  { %v4200_v19 = vpop.eup %4199  ;;  %v3886_v45 = vmul.f32 -1.442695, %v2846_v13  ;;  %v2829_v32 = vadd.f32 %v2828_v26, %v2810_v24 }
 0x36c   :  { %v4202_v63 = vpop.eup %4201  ;;  %v2863_v23 = vadd.f32 1.0, %v4200_v19  ;;  %v4223_v19 = vld [vmem:[%s4922_s4] ss:$0 sm:$0xff] }
 0x36d   :  { %v2867_v16 = vmul.f32 %v4202_v63, %v2862_v11  ;;  %4203 = vpow2.f32 %v3886_v45  ;;  %vm2872_vm11 = vweird.f32 %v4202_v63  ;;  %v998_v45 = vadd.f32 %v4223_v19, %v4803_v56 }
 0x36e   :  { %4205 = vrcp.f32 %v2863_v23  ;;  %vm2873_vm6 = vmor %vm2871_vm13, %vm2872_vm11  ;;  %v2892_v39 = vand.u32 2147483648, %v2863_v23  ;;  %v2890_v58 = vand.u32 2147483647, %v2863_v23  ;;  %vm2886_vm2 = vweird.f32 %v2863_v23 }
 0x36f   :  { %v2868_v15 = vsub.f32 1.0, %v2867_v16  ;;  %v1017_v16 = vadd.f32 %v4810_v37, %v998_v45  ;;  %vm2983_vm13 = vcmask 1041409  }
 0x370   :  { %v2847_v22 = vpop.f32.mrf.mxu2  ;;  %v2893_v4 = vor.u32 1.1754944e-38, %v2892_v39  ;;  %vm2891_vm12 = vcmp.eq.f32.partialorder %v2890_v58, 8.507059e+37 }
 0x371   :  { %v2869_v38 = vmul.f32 %v4202_v63, %v2868_v15  ;;  %v2848_v61 = vadd.f32 %v2847_v22, %v2829_v32 }
 0x373   :  { %v4204_v40 = vpop.eup %4203  ;;  %v2870_v27 = vadd.f32 %v4202_v63, %v2869_v38  ;;  %v3887_v10 = vmul.f32 -1.442695, %v2848_v61  ;;  %v4105_v38 = vld [vmem:[%s4924_s6] sm:$0xff] }
 0x374   :  { %v4206_v62 = vpop.eup %4205  ;;  %v4818_v49 = vadd.f32 1.0, %v4204_v40  ;;  %3042 = vmatpush.bf16.msrb.mxu3 %v4105_v38 }
 0x375   :  { %v2882_v42 = vmul.f32 %v4206_v62, %v2863_v23  ;;  %4207 = vpow2.f32 %v3887_v10  ;;  %v2874_v52 = vsel %vm2873_vm6, %v4202_v63, %v2870_v27  ;;  %vm2887_vm15 = vweird.f32 %v4206_v62 }
 0x376   :  { %4209 = vrcp.f32 %v4818_v49  ;;  %v2879_v59 = vsel %vm2876_vm8, %v2878_v9, %v2874_v52  ;;  %vm2888_vm7 = vmor %vm2886_vm2, %vm2887_vm15  ;;  %v2905_v55 = vand.u32 2147483647, %v4818_v49  ;;  %v2907_v13 = vand.u32 2147483648, %v4818_v49 }
 0x377   :  { %v2883_v53 = vsub.f32 1.0, %v2882_v42  ;;  %v4828_v30 = vmul.f32 %v2879_v59, %v4564_v33  ;;  %v4222_v33 = vld [vmem:[%s4918_s0 + $0x8] sm:$0xff]  ;;  %vm2901_vm10 = vweird.f32 %v4818_v49  ;;  %v1036_v27 = vadd.f32 %v4808_v20, %v1017_v16  ;;  %v4225_v20 = vld [vmem:[%s4918_s0 + $0x18] sm:$0xff] }
 0x378   :  { %v4844_v0 = vadd.f32 %v4222_v33, %v4649_v60  ;;  %vm2906_vm14 = vcmp.eq.f32.partialorder %v2905_v55, 8.507059e+37  ;;  %v2908_v32 = vor.u32 1.1754944e-38, %v2907_v13  ;;  %v4878_v52 = vadd.f32 %v4224_v18, %v4651_v5 }
 0x379   :  { %v2884_v47 = vmul.f32 %v4206_v62, %v2883_v53  ;;  %v2930_v36 = vadd.f32 %v4828_v30, %v4838_v44  ;;  %v4883_v53 = vadd.f32 %v4225_v20, %v1036_v27  ;;  %vm4961_vm6 = vcmask 1043456  }
 0x37a   :  { %v3108_v18 = vsub.f32 %v4838_v44, %v4828_v30 }
 0x37b   :  { %v4208_v2 = vpop.eup %4207  ;;  %v2885_v46 = vadd.f32 %v4206_v62, %v2884_v47 }
 0x37c   :  { %v4210_v51 = vpop.eup %4209  ;;  %v2865_v29 = vadd.f32 1.0, %v4208_v2 }
 0x37d   :  { %v2889_v6 = vsel %vm2888_vm7, %v4206_v62, %v2885_v46  ;;  %v2897_v12 = vmul.f32 %v4210_v51, %v4818_v49  ;;  %vm2902_vm0 = vweird.f32 %v4210_v51 }
 0x37e   :  { %v2894_v14 = vsel %vm2891_vm12, %v2893_v4, %v2889_v6  ;;  %4211 = vrcp.f32 %v2865_v29  ;;  %vm2903_vm9 = vmor %vm2901_vm10, %vm2902_vm0  ;;  %v2922_v25 = vand.u32 2147483648, %v2865_v29  ;;  %v2920_v56 = vand.u32 2147483647, %v2865_v29 }
 0x37f   :  { %v4847_v11 = vmul.f32 %v2894_v14, %v4572_v1  ;;  %v2898_v28 = vsub.f32 1.0, %v2897_v12  ;;  %4213 = vrcp.f32 %v4346_v3  ;;  %vm2916_vm3 = vweird.f32 %v2865_v29 }
 0x380   :  { %v2923_v37 = vor.u32 1.1754944e-38, %v2922_v25  ;;  %vm2921_vm5 = vcmp.eq.f32.partialorder %v2920_v56, 8.507059e+37  ;;  %vm3085_vm12 = vcmask 64512  }
 0x381   :  { %v2899_v8 = vmul.f32 %v4210_v51, %v2898_v28  ;;  %v2931_v34 = vadd.f32 %v4847_v11, %v4844_v0  ;;  %v3109_v20 = vsub.f32 %v4844_v0, %v4847_v11 }
 0x383   :  { %v2900_v60 = vadd.f32 %v4210_v51, %v2899_v8  ;;  %v2934_v21 = vadd.f32 %v2931_v34, %v2930_v36  ;;  %v4196_v34 = vld [vmem:[%s4925_s7] ss:$0 sm:$0xff]  ;;  %s4348_s7 = smov [#allocation11]  }
 0x384   :  { %v4212_v1 = vpop.eup %4211  ;;  %s3132_s8 = sshll.u32 %s4348_s7, 4  ;;  %s3133_s8 = int_to_ptr.vmem [resolvable:$true] %s3132_s8 }
 0x385   :  { %v2912_v63 = vmul.f32 %v4212_v1, %v2865_v29  ;;  %v2935_v23 = vrot.slane %v2934_v21, 4  ;;  %v4214_v26 = vpop.eup %4213  ;;  %v2904_v24 = vsel %vm2903_vm9, %v4210_v51, %v2900_v60  ;;  %vm2917_vm1 = vweird.f32 %v4212_v1 }
 0x386   :  { %v2909_v35 = vsel %vm2906_vm14, %v2908_v32, %v2904_v24  ;;  %v2949_v40 = vmul.f32 16.0, %v4214_v26  ;;  %vm2918_vm4 = vmor %vm2916_vm3, %vm2917_vm1  ;;  %vm2953_vm11 = vweird.f32 %v4214_v26 }
 0x387   :  { %v2913_v15 = vsub.f32 1.0, %v2912_v63  ;;  %v2936_v61 = vadd.f32 %v2935_v23, %v2934_v21  ;;  %v4872_v62 = vmul.f32 %v2909_v35, %v4599_v31  ;;  %v3091_v23 = vsel %vm4961_vm6, %v3084_v48, 0 }
 0x388   :  { %v2950_v42 = vsub.f32 1.0, %v2949_v40  ;;  %3100 = vmatpush.bf16.msra.mxu3 %v3091_v23 }
 0x389   :  { %v2914_v22 = vmul.f32 %v4212_v1, %v2913_v15  ;;  %v2937_v49 = vrot.slane %v2936_v61, 2  ;;  %v2932_v9 = vadd.f32 %v4872_v62, %v4878_v52 }
 0x38a   :  { %v2951_v58 = vmul.f32 %v4214_v26, %v2950_v42 }
 0x38b   :  { %v2915_v10 = vadd.f32 %v4212_v1, %v2914_v22  ;;  %v2938_v47 = vadd.f32 %v2937_v49, %v2936_v61 }
 0x38c   :  { %v2952_v2 = vadd.f32 %v4214_v26, %v2951_v58 }
 0x38d   :  { %v2919_v43 = vsel %vm2918_vm4, %v4212_v1, %v2915_v10  ;;  %v2939_v5 = vrot.slane %v2938_v47, 1 }
 0x38e   :  { %v2924_v50 = vsel %vm2921_vm5, %v2923_v37, %v2919_v43  ;;  %v2954_v29 = vsel %vm2953_vm11, %v4214_v26, %v2952_v2 }
 0x38f   :  { %v4886_v31 = vmul.f32 %v2924_v50, %v4609_v54  ;;  %v2940_v51 = vadd.f32 %v2939_v5, %v2938_v47 }
 0x391   :  { %v2933_v39 = vadd.f32 %v4886_v31, %v4883_v53  ;;  %v2955_v12 = vmul.f32 %v2954_v29, %v2940_v51  ;;  %v3111_v47 = vsub.f32 %v4883_v53, %v4886_v31 }
 0x393   :  { %v2941_v41 = vadd.f32 %v2933_v39, %v2932_v9  ;;  %v2957_v14 = vpack.c.bf16 %v2955_v12, %v2955_v12  ;;  %v3110_v39 = vsub.f32 %v4878_v52, %v4872_v62 }
 0x395   :  { %v2942_v59 = vrot.slane %v2941_v41, 4  ;;  %v2981_v28 = vunpack.c.l.b16 %v2957_v14 }
 0x397   :  { %v2943_v46 = vadd.f32 %v2942_v59, %v2941_v41 }
 0x399   :  { %v2944_v4 = vrot.slane %v2943_v46, 2 }
 0x39b   :  { %v2945_v6 = vadd.f32 %v2944_v4, %v2943_v46 }
 0x39d   :  { %v2946_v54 = vrot.slane %v2945_v6, 1 }
 0x39f   :  { %v2947_v7 = vadd.f32 %v2946_v54, %v2945_v6 }
 0x3a1   :  { %v2956_v57 = vmul.f32 %v2954_v29, %v2947_v7 }
 0x3a3   :  { %v2958_v33 = vpack.c.bf16 %v2956_v57, %v2956_v57 }
 0x3a5   :  { %v2982_v8 = vunpack.c.l.b16 %v2958_v33 }
 0x3a7   :  { %v2984_v17 = vsel %vm2983_vm13, %v2982_v8, %v2981_v28 }
 0x3a8   :  { %v2985_v36 = vpack.c.b16 %v2984_v17, %v2984_v17 }
 0x3aa   :  { %3043 = vmatmul.bf16.vlgmr.msrb.gmra.mxu3 %v2985_v36 }
 0x42d   :  { %v3044_v3 = vpop.f32.mrf.mxu3 }
 0x42e   :  { %v3045_v60 = vadd.f32 %v4196_v34, %v3044_v3 }
 0x430   :  { %3049 = vrot.lane.b32.xlu0 %v3045_v60, %s4347_s1 }
 0x435   :  { %v3046_v21 = vpop.f32.mrf.mxu3 }
 0x4a2   :  { %v3050_v1 = vpop.permute.xlu0 %3049 }
 0x4a3   :  { %v3052_v55 = vmax.f32 %v3045_v60, %v3050_v1 }
 0x4a5   :  { %3057 = vrot.lane.b32.xlu1 %v3052_v55, %s4339_s26  ;;  %v3053_v26 = vsub.f32 %v3045_v60, %v3052_v55 }
 0x4a7   :  { %v3054_v16 = vmul.f32 1.442695, %v3053_v26 }
 0x517   :  { %v3058_v13 = vpop.permute.xlu1 %3057 }
 0x518   :  { %v3060_v19 = vsub.f32 %v3045_v60, %v3058_v13 }
 0x51a   :  { %v3061_v45 = vmul.f32 1.442695, %v3060_v19 }
 0x51c   :  { %4215 = vpow2.f32 %v3061_v45 }
 0x51d   :  { %4217 = vpow2.f32 %v3054_v16 }
 0x522   :  { %v4216_v63 = vpop.eup %4215 }
 0x523   :  { %3064 = vrot.lane.b32.xlu2 %v4216_v63, %s4347_s1  ;;  %v4218_v24 = vpop.eup %4217 }
 0x57d   :  { %v3065_v15 = vpop.permute.xlu2 %3064 }
 0x57e   :  { %v3067_v32 = vadd.f32 %v4218_v24, %v3065_v15 }
 0x580   :  { %4219 = vrcp.f32 %v3067_v32  ;;  %v3079_v38 = vand.u32 2147483648, %v3067_v32  ;;  %v3077_v35 = vand.u32 2147483647, %v3067_v32  ;;  %vm3073_vm15 = vweird.f32 %v3067_v32 }
 0x582   :  { %v3080_v27 = vor.u32 1.1754944e-38, %v3079_v38  ;;  %vm3078_vm7 = vcmp.eq.f32.partialorder %v3077_v35, 8.507059e+37 }
 0x586   :  { %v4220_v25 = vpop.eup %4219 }
 0x587   :  { %v3069_v22 = vmul.f32 %v4220_v25, %v3067_v32  ;;  %vm3074_vm8 = vweird.f32 %v4220_v25 }
 0x588   :  { %vm3075_vm2 = vmor %vm3073_vm15, %vm3074_vm8 }
 0x589   :  { %v3070_v56 = vsub.f32 1.0, %v3069_v22 }
 0x58b   :  { %v3071_v61 = vmul.f32 %v4220_v25, %v3070_v56 }
 0x58d   :  { %v3072_v40 = vadd.f32 %v4220_v25, %v3071_v61 }
 0x58f   :  { %v3076_v10 = vsel %vm3075_vm2, %v4220_v25, %v3072_v40 }
 0x590   :  { %v3081_v37 = vsel %vm3078_vm7, %v3080_v27, %v3076_v10 }
 0x591   :  { %v3082_v43 = vmul.f32 %v4218_v24, %v3081_v37 }
 0x593   :  { %v3083_v49 = vpack.c.bf16 %v3082_v43, %v3082_v43 }
 0x595   :  { %3920 = vmatmul.msk.bf16.vlgmr.msra.gmra.mxu3 %vm3085_vm12, %v3083_v49 }
 0x618   :  { %v3102_v50 = vpop.f32.mrf.mxu3 }
 0x619   :  { %v3107_v42 = vrot.slane %v3102_v50, 1  ;;  %v3112_v9 = vperm.slane %v3102_v50, 0 }
 0x61b   :  { %v3113_v58 = vperm.slane %v3107_v42, 0  ;;  %v3116_v41 = vmul.f32 %v3112_v9, %v3108_v18  ;;  %v3117_v5 = vmul.f32 %v3112_v9, %v3109_v20 }
 0x61d   :  { %v3118_v59 = vmul.f32 %v3113_v58, %v3110_v39  ;;  %v3119_v2 = vmul.f32 %v3113_v58, %v3111_v47  ;;  %v3120_v46 = vadd.f32 %v3116_v41, %v4828_v30  ;;  %v3121_v51 = vadd.f32 %v3117_v5, %v4847_v11 }
 0x61f   :  { %v3122_v44 = vadd.f32 %v3118_v59, %v4872_v62  ;;  %v3123_v0 = vadd.f32 %v3119_v2, %v4886_v31  ;;  %3124 = vst [vmem:[#allocation11] sm:$0xff] %v3120_v46 }
 0x620   :  { %3125 = vst [vmem:[#allocation11 + $0x8] sm:$0xff] %v3121_v51  ;;  %v3104_v52 = vpop.f32.mrf.mxu3 }
 0x621   :  { %3126 = vst [vmem:[#allocation11 + $0x10] sm:$0xff] %v3122_v44 }
 0x622   :  { %3127 = vst [vmem:[#allocation11 + $0x18] sm:$0xff] %v3123_v0 }
 0x623   :  { %3140 = dma.vmem_to_hbm [thread:$0]  %s3133_s8, 512, %s3135_s12, [#allocation7], %s4338_s25, %s4338_s25, %s4339_s26  }
 0x624   :  { %4332 = dma.done.wait [#allocation7], 512  }
 0x625   :  { %4333 = vsyncadd [#allocation7], 4294966784 }
 0x626   :  { %3145 = vsyncpa [#allocation6], 1 }
 0x627   :  { %3146 = vsyncpa [#allocation9], 1 }
 0x628   :  { %3147 = vsyncpa [#allocation7], 1 }

</bundles_post_ra>
